<compile_context>
chip_gen: v7x
topology: tpu7x:2x2x1
jax: 0.10.0
libtpu: 0.0.40
codegen_flags: <defaults>
</compile_context>

<pallas_src>
import jax
import jax.numpy as jnp
from jax.experimental import pallas as pl
from jax.experimental.pallas import tpu as pltpu


_MIN_PALLAS_OUT_BYTES = 1 << 20        # below this, XLA's fused concat wins
_MEGACORE_SPLIT_BYTES = 4 << 20        # want >= 2 grid steps above this
_SUBLANE_ALIGN = {4: 8, 2: 16, 1: 32}  # sublane packing per itemsize


def _budgets():
    """(per-step output tile budget, vmem_limit_bytes) tuned per generation."""
    vmem_bytes = None
    try:
        vmem_bytes = pltpu.get_tpu_info().vmem_capacity_bytes
    except Exception:
        vmem_bytes = None
    if vmem_bytes is not None and vmem_bytes >= 128 * 1024 * 1024:
        # v5e / v6e: 128 MiB physical VMEM -> bigger tiles, fewer steps.
        return 8 * 1024 * 1024, 64 * 1024 * 1024
    # v7x (64 MiB physical / 32 MiB scoped default) or unknown: conservative.
    return 6 * 1024 * 1024, 32 * 1024 * 1024


def _make_concat_kernel(widths, offsets):
    def kernel(*refs):
        *in_refs, o_ref = refs
        for x_ref, off, w in zip(in_refs, offsets, widths):
            # Static column slice -> zero-cost ref view; offsets are gated to
            # be 128-multiples so the store is an unmasked lane-dense vst.
            # Dtype promotion (if any) is fused into the copy here.
            o_ref[:, off:off + w] = x_ref[...].astype(o_ref.dtype)
    return kernel


def _choose_row_tile(outer, row_bytes, sub, tile_budget, out_bytes):
    """Largest sublane-aligned row tile fitting the per-step VMEM budget.

    Returns None when even a minimal aligned tile blows the budget (huge rows,
    tiny `outer`); caller falls back to XLA's concat for that layout.
    """
    if row_bytes * sub > tile_budget:
        return None
    max_tm = (tile_budget // row_bytes) // sub * sub
    tm = outer if max_tm >= outer else max_tm
    # v7x megacore: make sure the "parallel" axis has >= 2 steps when there is
    # enough data for both TensorCores to matter (no effect on v5e/v6e).
    if out_bytes >= _MEGACORE_SPLIT_BYTES and outer >= 2 * sub:
        half = -(-outer // 2)            # ceil(outer / 2)
        half = -(-half // sub) * sub     # round up to sublane alignment
        tm = min(tm, half)
    return max(tm, min(sub, outer))


def concatenate(*inputs, dim=1):
    """JAX/Pallas equivalent of Concatenate.forward: torch.cat(inputs, dim)."""
    if len(inputs) == 0:
        raise ValueError("concatenate expects at least one input")
    ndim = inputs[0].ndim
    if dim < 0:
        dim += ndim
    assert 0 <= dim < ndim, "invalid concat dim"
    ref_shape = inputs[0].shape
    for x in inputs:
        assert x.ndim == ndim, "all inputs must have the same rank"
        assert x.shape[:dim] == ref_shape[:dim], "non-concat dims must match"
        assert x.shape[dim + 1:] == ref_shape[dim + 1:], "non-concat dims must match"

    # TODO(synk): jnp.result_type may differ from torch.cat's promotion rules
    # in mixed int/float corner cases.
    out_dtype = jnp.result_type(*[x.dtype for x in inputs])

    outer = 1
    for s in ref_shape[:dim]:
        outer *= s
    widths, flats = [], []
    for x in inputs:
        inner = 1
        for s in x.shape[dim:]:
            inner *= s
        widths.append(inner)
        flats.append(x.reshape(outer, inner))   # keep native dtype; cast in-kernel
    total = sum(widths)
    out_shape_nd = (ref_shape[:dim]
                    + (sum(x.shape[dim] for x in inputs),)
                    + ref_shape[dim + 1:])

    offsets, off = [], 0
    for w in widths:
        offsets.append(off)
        off += w

    itemsize = jnp.dtype(out_dtype).itemsize
    row_bytes = total * itemsize
    out_bytes = outer * row_bytes
    in_bytes = sum(outer * w * jnp.dtype(x.dtype).itemsize
                   for w, x in zip(widths, inputs))

    def _xla_concat():
        return jnp.concatenate([x.astype(out_dtype) for x in inputs], axis=dim)

    # Tiny concats: pallas_call launch overhead outweighs any gain.
    if out_bytes < _MIN_PALLAS_OUT_BYTES:
        return _xla_concat()
    # Non-128-multiple column offsets would force masked vst.msk / lane
    # rotates at every slice boundary; XLA's fused concat handles those fine.
    if any(o % 128 != 0 for o in offsets):
        return _xla_concat()

    tile_budget, vmem_limit = _budgets()
    sub = _SUBLANE_ALIGN.get(itemsize, 8)
    tm = _choose_row_tile(outer, row_bytes, sub, tile_budget, out_bytes)
    if tm is None:
        # TODO(synk): huge rows with tiny `outer` need per-input column tiling
        # across the concat boundary; defer to XLA's concat for that layout.
        return _xla_concat()

    grid = (pl.cdiv(outer, tm),)
    flat_out = pl.pallas_call(
        _make_concat_kernel(widths, offsets),
        out_shape=jax.ShapeDtypeStruct((outer, total), out_dtype),
        grid_spec=pltpu.PrefetchScalarGridSpec(
            num_scalar_prefetch=0,
            grid=grid,
            in_specs=[pl.BlockSpec((tm, w), lambda r: (r, 0)) for w in widths],
            out_specs=pl.BlockSpec((tm, total), lambda r: (r, 0)),
        ),
        compiler_params=pltpu.CompilerParams(
            dimension_semantics=("parallel",),
            vmem_limit_bytes=vmem_limit,
        ),
        cost_estimate=pl.CostEstimate(
            flops=0, transcendentals=0, bytes_accessed=in_bytes + out_bytes),
    )(*flats)
    return flat_out.reshape(out_shape_nd)


if __name__ == "__main__":
    key = jax.random.PRNGKey(0)
    k1, k2, k3, k4, k5, k6 = jax.random.split(key, 6)

    # --- small shapes (XLA short-circuit path), typical NCHW usage ----------
    a = jax.random.normal(k1, (2, 4, 16, 16), dtype=jnp.float32)
    b = jax.random.normal(k2, (2, 4, 16, 16), dtype=jnp.float32)
    y = concatenate(a, b, dim=1)
    jax.block_until_ready(y)
    assert y.shape == (2, 8, 16, 16)
    assert jnp.array_equal(y, jnp.concatenate([a, b], axis=1))

    c = jax.random.normal(k3, (2, 2, 16, 16), dtype=jnp.float32)
    y2 = concatenate(a, c, dim=1)
    jax.block_until_ready(y2)
    assert jnp.array_equal(y2, jnp.concatenate([a, c], axis=1))

    d = jax.random.normal(k4, (2, 32), dtype=jnp.float32)
    e = jax.random.normal(k5, (2, 32), dtype=jnp.float32)
    y3 = concatenate(d, e, dim=1)
    jax.block_until_ready(y3)
    assert jnp.array_equal(y3, jnp.concatenate([d, e], axis=1))

    y4 = concatenate(a, b, dim=0)
    jax.block_until_ready(y4)
    assert jnp.array_equal(y4, jnp.concatenate([a, b], axis=0))

    # --- Pallas path: multi-step parallel grid (exact tiling) ---------------
    p1 = jax.random.normal(k1, (64, 32, 16, 16), dtype=jnp.float32)
    p2 = jax.random.normal(k2, (64, 32, 16, 16), dtype=jnp.float32)
    yp = concatenate(p1, p2, dim=1)
    jax.block_until_ready(yp)
    assert yp.shape == (64, 64, 16, 16)
    assert jnp.array_equal(yp, jnp.concatenate([p1, p2], axis=1))

    # --- Pallas path: partial (masked) last row tile -------------------------
    q1 = jax.random.normal(k3, (24, 24, 32, 32), dtype=jnp.float32)
    q2 = jax.random.normal(k4, (24, 24, 32, 32), dtype=jnp.float32)
    yq = concatenate(q1, q2, dim=1)
    jax.block_until_ready(yq)
    assert yq.shape == (24, 48, 32, 32)
    assert jnp.array_equal(yq, jnp.concatenate([q1, q2], axis=1))

    # --- Pallas path: mixed dtype, promotion fused into the kernel ----------
    m1 = jax.random.normal(k5, (64, 32, 16, 16), dtype=jnp.float32)
    m2 = jax.random.normal(k6, (64, 32, 16, 16), dtype=jnp.bfloat16)
    ym = concatenate(m1, m2, dim=1)
    jax.block_until_ready(ym)
    assert ym.dtype == jnp.float32
    assert jnp.array_equal(ym, jnp.concatenate([m1, m2.astype(jnp.float32)], axis=1))

    # --- batch-dim concat with outer == 1 (XLA fallback path) ---------------
    yb = concatenate(p1, p2, dim=0)
    jax.block_until_ready(yb)
    assert jnp.array_equal(yb, jnp.concatenate([p1, p2], axis=0))

    print("KERNEL_OK")
</pallas_src>

<mosaic_0001>
module attributes {stable_mosaic.version = 11 : i64} {
  func.func @kernel(%arg0: i32, %arg1: memref<32x8192xf32, #tpu.memory_space<vmem>>, %arg2: memref<32x8192xf32, #tpu.memory_space<vmem>>, %arg3: memref<32x16384xf32, #tpu.memory_space<vmem>>) attributes {dimension_semantics = [#tpu.dimension_semantics<parallel>], iteration_bounds = array<i64: 2>, scalar_prefetch = 0 : i64, scratch_operands = 0 : i64, tpu.core_type = #tpu.core_type<tc>, window_params = [{transform_indices = @transform_0, window_bounds = array<i64: 32, 8192>}, {transform_indices = @transform_1, window_bounds = array<i64: 32, 8192>}, {transform_indices = @transform_2, window_bounds = array<i64: 32, 16384>}]} {
    %c0 = arith.constant 0 : index
    %c0_0 = arith.constant 0 : index
    %0 = vector.load %arg1[%c0, %c0_0] : memref<32x8192xf32, #tpu.memory_space<vmem>>, vector<32x8192xf32>
    %c0_1 = arith.constant 0 : index
    %c0_2 = arith.constant 0 : index
    %1 = vector.load %arg3[%c0_1, %c0_2] : memref<32x16384xf32, #tpu.memory_space<vmem>>, vector<32x8192xf32>
    tpu.vector_store %arg3[%c0_1, %c0_2], %0 {strides = array<i32>} : memref<32x16384xf32, #tpu.memory_space<vmem>>, vector<32x8192xf32>,
    %c0_3 = arith.constant 0 : index
    %c0_4 = arith.constant 0 : index
    %2 = vector.load %arg2[%c0_3, %c0_4] : memref<32x8192xf32, #tpu.memory_space<vmem>>, vector<32x8192xf32>
    %c0_5 = arith.constant 0 : index
    %c8192 = arith.constant 8192 : index
    %3 = vector.load %arg3[%c0_5, %c8192] : memref<32x16384xf32, #tpu.memory_space<vmem>>, vector<32x8192xf32>
    tpu.vector_store %arg3[%c0_5, %c8192], %2 {strides = array<i32>} : memref<32x16384xf32, #tpu.memory_space<vmem>>, vector<32x8192xf32>,
    return
  }
  func.func @transform_0(%arg0: i32) -> (i32, i32) {
    %c0_i32 = arith.constant 0 : i32
    %c0_i32_0 = arith.constant 0 : i32
    return %arg0, %c0_i32 : i32, i32
  }
  func.func @transform_1(%arg0: i32) -> (i32, i32) {
    %c0_i32 = arith.constant 0 : i32
    %c0_i32_0 = arith.constant 0 : i32
    return %arg0, %c0_i32 : i32, i32
  }
  func.func @transform_2(%arg0: i32) -> (i32, i32) {
    %c0_i32 = arith.constant 0 : i32
    %c0_i32_0 = arith.constant 0 : i32
    return %arg0, %c0_i32 : i32, i32
  }
}

</mosaic_0001>

<bundles_post_ra>
// kernel: tpu_custom_call.1
= control target key start
LH: loop header
LB: loop body
LE: loop exit
PB: predicated region body
PF: predicated region fallthrough
CT: control target
= control target key end

     0   :  { %7 = vsyncpa [#allocation3], 0  ;;  %s2833_s0 = inlined_call_operand.hbm [shape: f32[64,8192], index: 0, kind: input, shape index: {}]   ;;  %s2834_s1 = inlined_call_operand.hbm [shape: f32[64,8192], index: 1, kind: input, shape index: {}]   ;;  %s2835_s2 = inlined_call_operand.hbm [shape: f32[64,16384], index: 2, kind: output, shape index: {}]  }
   0x1   :  { %9 = vsyncpa [#allocation3 + $0x1], 0 }
   0x2   :  { %10 = vsyncpa [#allocation6], 0 }
   0x3   :  { %12 = vsyncpa [#allocation6 + $0x1], 0 }
   0x4   :  { %13 = vsyncpa [#allocation4], 0 }
   0x5   :  { %15 = vsyncpa [#allocation4 + $0x1], 0  ;;  %s1578_s9 = smov 0   ;;  %s1580_s10 = smov 0  }
   0x6   :  { %s1582_s11 = smov 0   ;;  %s1584_s12 = smov 0  }
   0x7 LB: > { %s1599_s13 = sadd.s32 4294967295, %s1554_s12   ;;  %s1342_s14 = sadd.s32 4294967294, %s1554_s12   ;;  %s1554_s12 = sphi %s1584_s12, %s2851_s12   ;;  %s1550_s11 = sphi %s1582_s11, %s2850_s11   ;;  %s1546_s10 = sphi %s1580_s10, %s2849_s10   ;;  %s1542_s9 = sphi %s1578_s9, %s2848_s9  }
   0x8   : > { %s1603_s15 = sadd.s32 1, %s1554_s12   ;;  %s28_s16 = sadd.s32 1, %s1550_s11 }
   0x9   : > { %s25_s17 = ssub.s32 %s1554_s12, %s1603_s15  ;;  %p35_p0 = scmp.ne.s32.totalorder %s1550_s11, %s1546_s10 }
   0xa   : > { %p26_p1 = scmp.eq.s32.totalorder %s25_s17, 0  ;;  %p36_p2 = scmp.eq.s32.totalorder %s1554_s12, 0 }
   0xb   : > { %p41_p3 = scmp.ne.s32.totalorder %s1546_s10, %s1542_s9  ;;  %p42_p4 = scmp.eq.s32.totalorder %s1599_s13, 0 }
   0xc   : > { %s1615_s18 = scalar_select %p26_p1, %s1550_s11, %s28_s16  }
   0xd   : > { %p1617_p5 = por %p36_p2, %p35_p0  ;;  %p1621_p6 = por %p42_p4, %p41_p3 }
   0xe   : > { %p91_p7 = scmp.eq.s32.totalorder %s1599_s13, 1  ;;  %p97_p8 = scmp.eq.s32.totalorder %s1342_s14, 1 }
   0xf   : > { %s2839_s20 = scalar_select %p1621_p6, 1, 0 }
  0x10   : > { %p1386_p10 = scmp.lt.s32.totalorder %s1554_s12, 2  ;;  %p1628_p11 = por %p91_p7, %p35_p0 }
  0x11   : > { %p1632_p12 = por %p97_p8, %p41_p3  ;;  %s1637_s23 = sand.u32 1, %s1550_s11  }
  0x12   : > { %s2840_s21 = scalar_select %p1628_p11, 1, 0 }
  0x13   : > { %s2841_s22 = scalar_select %p1632_p12, 1, 0 }
  0x14   : > { %s1364_s24 = sshll.u32 %s1554_s12, 15  ;;  %s1345_s25 = sshll.u32 %s1637_s23, 11 }
  0x15   : > { %s1646_s28 = scalar_lea.hbm %s2833_s0, %s1364_s24  ;;  %s121_s29 = scalar_lea.vmem [#allocation2], %s1345_s25 }
  0x16   : > { %s129_s30 = sshll.u32 %s121_s29, 4  ;;  %p1652_p13 = pnand %p1386_p10, %p1617_p5  ;;  %s1656_s30 = int_to_ptr.vmem [resolvable:$true] %s129_s30 }
  0x17   : > { %s118_s4 = scalar_lea.sflag [#allocation3], %s1637_s23  ;;  %s1424_s5 = scalar_lea.hbm %s1646_s28, 32768 }
  0x18   : > { %p1425_p0 = scmp.ne.s32.totalorder %s1646_s28, %s1424_s5  ;;  %p1426_p1 = pneg %p1652_p13 }
  0x19   : > { %s1429_s8 = scalar_lea.hbm %s2833_s0, 65536  ;;  %p1430_p4 = scmp.lt.u32.totalorder %s1646_s28, %s2833_s0 }
  0x1a   : > { %p1427_p2 = pnand %p1426_p1, %p1425_p0  ;;  %p1431_p5 = scmp.lt.u32.totalorder %s1429_s8, %s1424_s5 }
  0x1b   : > { %p1433_p8 = scmp.lt.u32.totalorder %s1424_s5, %s1646_s28 }
  0x1c   : > { %p1428_p3 = pneg %p1427_p2  ;;  %p1432_p7 = por %p1431_p5, %p1430_p4 }
  0x1e   : > { %p1434_p10 = por %p1433_p8, %p1432_p7 }
  0x20   : > { %p1435_p9 = pnand %p1434_p10, %p1428_p3 }
  0x22   : > { %1438 = shalt.err (!%p1435_p9)
}
  0x23   : > { %s1439_s17 = scalar_lea.vmem %s1656_s30, 32768  ;;  %s1556_s19 = smov [#allocation2]  }
  0x24   : > { %p1440_p0 = scmp.ne.s32.totalorder %s1656_s30, %s1439_s17  ;;  %s1444_s26 = sshll.u32 %s1556_s19, 4  ;;  %s1445_s26 = int_to_ptr.vmem [resolvable:$false] %s1444_s26 }
  0x25   : > { %s1446_s27 = scalar_lea.vmem %s1445_s26, 65536  ;;  %p1447_p11 = scmp.lt.s32.totalorder %s1656_s30, %s1445_s26 }
  0x26   : > { %p1442_p2 = pnand %p1440_p0, %p1426_p1  ;;  %p1448_p4 = scmp.lt.s32.totalorder %s1446_s27, %s1439_s17 }
  0x28   : > { %p1443_p12 = pneg %p1442_p2  ;;  %p1449_p5 = por %p1448_p4, %p1447_p11 }
  0x2a   : > { %p1450_p7 = pnand %p1449_p5, %p1443_p12 }
  0x2c   : > { %1453 = shalt.err (!%p1450_p7)
}
  0x2d   : > { %s1557_s29 = smov 8192   ;;  %s1558_s5 = smov 512  }
  0x2e   : > { %1378 = dma.hbm_to_vmem [thread:$0]  (!%p1652_p13), %s1646_s28, 32768, %s1656_s30, %s118_s4, %s1557_s29, %s1557_s29, %s1558_s5  }
  0x2f   : > { %p1353_p9 = scmp.ge.s32.totalorder %s1554_s12, 1  ;;  %p159_p11 = scmp.lt.s32.totalorder %s1554_s12, 3 }
  0x30   : > { %s1700_s14 = scalar_lea.hbm %s2834_s1, %s1364_s24  ;;  %s143_s16 = scalar_lea.vmem [#allocation5], %s1345_s25 }
  0x31   : > { %p1691_p12 = pnand %p1353_p9, %p159_p11  ;;  %s151_s17 = sshll.u32 %s143_s16, 4  ;;  %s1704_s17 = int_to_ptr.vmem [resolvable:$true] %s151_s17 }
  0x32   : > { %s140_s28 = scalar_lea.sflag [#allocation6], %s1637_s23  ;;  %s1454_s30 = scalar_lea.hbm %s1700_s14, 32768 }
  0x33   : > { %p1455_p3 = scmp.ne.s32.totalorder %s1700_s14, %s1454_s30  ;;  %s1459_s24 = scalar_lea.hbm %s2834_s1, 65536 }
  0x34   : > { %p1460_p0 = scmp.lt.u32.totalorder %s1700_s14, %s2834_s1  ;;  %p1461_p2 = scmp.lt.u32.totalorder %s1459_s24, %s1454_s30 }
  0x35   : > { %p1457_p8 = pnand %p1455_p3, %p1426_p1  ;;  %p1463_p5 = scmp.lt.u32.totalorder %s1454_s30, %s1700_s14 }
  0x36   : > { %p1462_p4 = por %p1461_p2, %p1460_p0 }
  0x37   : > { %p1458_p10 = pneg %p1457_p8 }
  0x38   : > { %p1464_p7 = por %p1463_p5, %p1462_p4 }
  0x3a   : > { %p1465_p9 = pnand %p1464_p7, %p1458_p10 }
  0x3c   : > { %1468 = shalt.err (!%p1465_p9)
}
  0x3d   : > { %s1469_s25 = scalar_lea.vmem %s1704_s17, 32768  ;;  %s1559_s7 = smov [#allocation5]  }
  0x3e   : > { %p1470_p11 = scmp.ne.s32.totalorder %s1704_s17, %s1469_s25  ;;  %s1474_s8 = sshll.u32 %s1559_s7, 4  ;;  %s1475_s8 = int_to_ptr.vmem [resolvable:$false] %s1474_s8 }
  0x3f   : > { %s1476_s16 = scalar_lea.vmem %s1475_s8, 65536  ;;  %p1477_p6 = scmp.lt.s32.totalorder %s1704_s17, %s1475_s8 }
  0x40   : > { %p1472_p3 = pnand %p1470_p11, %p1426_p1  ;;  %p1478_p0 = scmp.lt.s32.totalorder %s1476_s16, %s1469_s25 }
  0x42   : > { %p1473_p8 = pneg %p1472_p3  ;;  %p1479_p2 = por %p1478_p0, %p1477_p6 }
  0x44   : > { %p1480_p4 = pnand %p1479_p2, %p1473_p8 }
  0x46   : > { %1483 = shalt.err (!%p1480_p4)
}
  0x47   : > { %1381 = dma.hbm_to_vmem [thread:$0]  (!%p1652_p13), %s1700_s14, 32768, %s1704_s17, %s140_s28, %s1557_s29, %s1557_s29, %s1558_s5  }
  0x48   : > { %163 = sbr.rel (%p1691_p12) target bundleno = 354 (0x162), region = 28  ;;  %s1738_s30 = sand.u32 (!%p1691_p12), 1, %s1546_s10  }
  0x49   : > { %s1354_s4 = sshll.u32 (!%p1691_p12), %s1738_s30, 11  ;;  %s166_s19 = scalar_lea.sflag (!%p1691_p12), [#allocation3], %s1738_s30 }
  0x4a   : > { %s1742_s3 = scalar_lea.vmem (!%p1691_p12), [#allocation2], %s1354_s4  ;;  %p2844_p6 = scmp.ne.s32.totalorder (!%p1691_p12), %s2839_s20, 0 }
  0x4f   : > { %1529 = dma.done.wait (%p2844_p6), %s166_s19, 32768  }
  0x50   : > { %1531 = vsyncadd (%p2844_p6), %s166_s19, 4294934528  ;;  %s175_s23 = scalar_lea.sflag [#allocation6], %s1738_s30  ;;  %s1749_s29 = scalar_lea.vmem [#allocation5], %s1354_s4 }
  0x51   : > { %1533 = dma.done.wait (%p2844_p6), %s175_s23, 32768  }
  0x52   : > { %1535 = vsyncadd (%p2844_p6), %s175_s23, 4294934528  ;;  %s1356_s5 = sshll.u32 %s1738_s30, 12  ;;  %v207_v0 = vld [vmem:[%s1742_s3] sm:$0xff]  ;;  %v208_v1 = vld [vmem:[%s1742_s3 + $0x8] sm:$0xff]  ;;  %s1368_s20 = sshll.u32 %s1599_s13, 16 }
  0x53   : > { %v209_v2 = vld [vmem:[%s1742_s3 + $0x10] sm:$0xff]  ;;  %s1759_s6 = scalar_lea.vmem [#allocation7], %s1356_s5  ;;  %v210_v3 = vld [vmem:[%s1742_s3 + $0x18] sm:$0xff]  ;;  %v211_v4 = vld [vmem:[%s1742_s3 + $0x20] sm:$0xff]  ;;  %s2774_s28 = scalar_lea.hbm %s2835_s2, %s1368_s20 }
  0x54   : > { %463 = vst [vmem:[%s1759_s6] sm:$0xff] %v207_v0  ;;  %464 = vst [vmem:[%s1759_s6 + $0x8] sm:$0xff] %v208_v1  ;;  %v212_v5 = vld [vmem:[%s1742_s3 + $0x28] sm:$0xff]  ;;  %v213_v6 = vld [vmem:[%s1742_s3 + $0x30] sm:$0xff]  ;;  %s1246_s14 = sshll.u32 %s1759_s6, 4  ;;  %s1232_s24 = scalar_lea.sflag [#allocation4], %s1738_s30  ;;  %s2776_s14 = int_to_ptr.vmem [resolvable:$true] %s1246_s14 }
  0x55   : > { %465 = vst [vmem:[%s1759_s6 + $0x10] sm:$0xff] %v209_v2  ;;  %466 = vst [vmem:[%s1759_s6 + $0x18] sm:$0xff] %v210_v3  ;;  %v214_v7 = vld [vmem:[%s1742_s3 + $0x38] sm:$0xff]  ;;  %v215_v8 = vld [vmem:[%s1742_s3 + $0x40] sm:$0xff]  ;;  %s1484_s26 = scalar_lea.vmem %s2776_s14, 65536  ;;  %p2845_p1 = scmp.ne.s32.totalorder %s2840_s21, 0 }
  0x56   : > { %467 = vst [vmem:[%s1759_s6 + $0x20] sm:$0xff] %v211_v4  ;;  %468 = vst [vmem:[%s1759_s6 + $0x28] sm:$0xff] %v212_v5  ;;  %v216_v9 = vld [vmem:[%s1742_s3 + $0x48] sm:$0xff]  ;;  %v217_v10 = vld [vmem:[%s1742_s3 + $0x50] sm:$0xff]  ;;  %p1485_p13 = scmp.ne.s32.totalorder %s2776_s14, %s1484_s26  ;;  %s1560_s27 = smov [#allocation7]  }
  0x57   : > { %469 = vst [vmem:[%s1759_s6 + $0x30] sm:$0xff] %v213_v6  ;;  %470 = vst [vmem:[%s1759_s6 + $0x38] sm:$0xff] %v214_v7  ;;  %v218_v11 = vld [vmem:[%s1742_s3 + $0x58] sm:$0xff]  ;;  %v219_v12 = vld [vmem:[%s1742_s3 + $0x60] sm:$0xff]  ;;  %s1488_s25 = sshll.u32 %s1560_s27, 4  ;;  %s1489_s25 = int_to_ptr.vmem [resolvable:$false] %s1488_s25 }
  0x58   : > { %471 = vst [vmem:[%s1759_s6 + $0x40] sm:$0xff] %v215_v8  ;;  %472 = vst [vmem:[%s1759_s6 + $0x48] sm:$0xff] %v216_v9  ;;  %v220_v13 = vld [vmem:[%s1742_s3 + $0x68] sm:$0xff]  ;;  %v221_v14 = vld [vmem:[%s1742_s3 + $0x70] sm:$0xff]  ;;  %p1486_p12 = pnand %p1485_p13, %p2845_p1  ;;  %s1490_s7 = scalar_lea.vmem %s1489_s25, 131072 }
  0x59   : > { %473 = vst [vmem:[%s1759_s6 + $0x50] sm:$0xff] %v217_v10  ;;  %474 = vst [vmem:[%s1759_s6 + $0x58] sm:$0xff] %v218_v11  ;;  %v222_v15 = vld [vmem:[%s1742_s3 + $0x78] sm:$0xff]  ;;  %v223_v16 = vld [vmem:[%s1742_s3 + $0x80] sm:$0xff]  ;;  %p1491_p5 = scmp.lt.s32.totalorder %s2776_s14, %s1489_s25  ;;  %p1492_p7 = scmp.lt.s32.totalorder %s1490_s7, %s1484_s26 }
  0x5a   : > { %475 = vst [vmem:[%s1759_s6 + $0x60] sm:$0xff] %v219_v12  ;;  %476 = vst [vmem:[%s1759_s6 + $0x68] sm:$0xff] %v220_v13  ;;  %v224_v17 = vld [vmem:[%s1742_s3 + $0x88] sm:$0xff]  ;;  %v225_v18 = vld [vmem:[%s1742_s3 + $0x90] sm:$0xff]  ;;  %p1487_p10 = pneg %p1486_p12 }
  0x5b   : > { %477 = vst [vmem:[%s1759_s6 + $0x70] sm:$0xff] %v221_v14  ;;  %478 = vst [vmem:[%s1759_s6 + $0x78] sm:$0xff] %v222_v15  ;;  %v226_v19 = vld [vmem:[%s1742_s3 + $0x98] sm:$0xff]  ;;  %v227_v20 = vld [vmem:[%s1742_s3 + $0xa0] sm:$0xff]  ;;  %p1493_p9 = por %p1492_p7, %p1491_p5 }
  0x5c   : > { %479 = vst [vmem:[%s1759_s6 + $0x80] sm:$0xff] %v223_v16  ;;  %480 = vst [vmem:[%s1759_s6 + $0x88] sm:$0xff] %v224_v17  ;;  %v228_v21 = vld [vmem:[%s1742_s3 + $0xa8] sm:$0xff]  ;;  %v229_v22 = vld [vmem:[%s1742_s3 + $0xb0] sm:$0xff] }
  0x5d   : > { %481 = vst [vmem:[%s1759_s6 + $0x90] sm:$0xff] %v225_v18  ;;  %482 = vst [vmem:[%s1759_s6 + $0x98] sm:$0xff] %v226_v19  ;;  %v230_v23 = vld [vmem:[%s1742_s3 + $0xb8] sm:$0xff]  ;;  %v231_v24 = vld [vmem:[%s1742_s3 + $0xc0] sm:$0xff]  ;;  %p1494_p11 = pnand %p1493_p9, %p1487_p10 }
  0x5e   : > { %483 = vst [vmem:[%s1759_s6 + $0xa0] sm:$0xff] %v227_v20  ;;  %484 = vst [vmem:[%s1759_s6 + $0xa8] sm:$0xff] %v228_v21  ;;  %v232_v25 = vld [vmem:[%s1742_s3 + $0xc8] sm:$0xff]  ;;  %v233_v26 = vld [vmem:[%s1742_s3 + $0xd0] sm:$0xff] }
  0x5f   : > { %485 = vst [vmem:[%s1759_s6 + $0xb0] sm:$0xff] %v229_v22  ;;  %486 = vst [vmem:[%s1759_s6 + $0xb8] sm:$0xff] %v230_v23  ;;  %v234_v27 = vld [vmem:[%s1742_s3 + $0xd8] sm:$0xff]  ;;  %v235_v28 = vld [vmem:[%s1742_s3 + $0xe0] sm:$0xff] }
  0x60   : > { %487 = vst [vmem:[%s1759_s6 + $0xc0] sm:$0xff] %v231_v24  ;;  %488 = vst [vmem:[%s1759_s6 + $0xc8] sm:$0xff] %v232_v25  ;;  %v236_v29 = vld [vmem:[%s1742_s3 + $0xe8] sm:$0xff]  ;;  %v237_v30 = vld [vmem:[%s1742_s3 + $0xf0] sm:$0xff] }
  0x61   : > { %489 = vst [vmem:[%s1759_s6 + $0xd0] sm:$0xff] %v233_v26  ;;  %490 = vst [vmem:[%s1759_s6 + $0xd8] sm:$0xff] %v234_v27  ;;  %v238_v31 = vld [vmem:[%s1742_s3 + $0xf8] sm:$0xff]  ;;  %v239_v32 = vld [vmem:[%s1742_s3 + $0x100] sm:$0xff] }
  0x62   : > { %491 = vst [vmem:[%s1759_s6 + $0xe0] sm:$0xff] %v235_v28  ;;  %492 = vst [vmem:[%s1759_s6 + $0xe8] sm:$0xff] %v236_v29  ;;  %v240_v33 = vld [vmem:[%s1742_s3 + $0x108] sm:$0xff]  ;;  %v241_v34 = vld [vmem:[%s1742_s3 + $0x110] sm:$0xff] }
  0x63   : > { %493 = vst [vmem:[%s1759_s6 + $0xf0] sm:$0xff] %v237_v30  ;;  %494 = vst [vmem:[%s1759_s6 + $0xf8] sm:$0xff] %v238_v31  ;;  %v242_v35 = vld [vmem:[%s1742_s3 + $0x118] sm:$0xff]  ;;  %v243_v36 = vld [vmem:[%s1742_s3 + $0x120] sm:$0xff] }
  0x64   : > { %495 = vst [vmem:[%s1759_s6 + $0x100] sm:$0xff] %v239_v32  ;;  %496 = vst [vmem:[%s1759_s6 + $0x108] sm:$0xff] %v240_v33  ;;  %v244_v37 = vld [vmem:[%s1742_s3 + $0x128] sm:$0xff]  ;;  %v245_v38 = vld [vmem:[%s1742_s3 + $0x130] sm:$0xff] }
  0x65   : > { %497 = vst [vmem:[%s1759_s6 + $0x110] sm:$0xff] %v241_v34  ;;  %498 = vst [vmem:[%s1759_s6 + $0x118] sm:$0xff] %v242_v35  ;;  %v246_v39 = vld [vmem:[%s1742_s3 + $0x138] sm:$0xff]  ;;  %v247_v40 = vld [vmem:[%s1742_s3 + $0x140] sm:$0xff] }
  0x66   : > { %499 = vst [vmem:[%s1759_s6 + $0x120] sm:$0xff] %v243_v36  ;;  %500 = vst [vmem:[%s1759_s6 + $0x128] sm:$0xff] %v244_v37  ;;  %v248_v41 = vld [vmem:[%s1742_s3 + $0x148] sm:$0xff]  ;;  %v249_v42 = vld [vmem:[%s1742_s3 + $0x150] sm:$0xff] }
  0x67   : > { %501 = vst [vmem:[%s1759_s6 + $0x130] sm:$0xff] %v245_v38  ;;  %502 = vst [vmem:[%s1759_s6 + $0x138] sm:$0xff] %v246_v39  ;;  %v250_v43 = vld [vmem:[%s1742_s3 + $0x158] sm:$0xff]  ;;  %v251_v44 = vld [vmem:[%s1742_s3 + $0x160] sm:$0xff] }
  0x68   : > { %503 = vst [vmem:[%s1759_s6 + $0x140] sm:$0xff] %v247_v40  ;;  %504 = vst [vmem:[%s1759_s6 + $0x148] sm:$0xff] %v248_v41  ;;  %v252_v45 = vld [vmem:[%s1742_s3 + $0x168] sm:$0xff]  ;;  %v253_v46 = vld [vmem:[%s1742_s3 + $0x170] sm:$0xff] }
  0x69   : > { %505 = vst [vmem:[%s1759_s6 + $0x150] sm:$0xff] %v249_v42  ;;  %506 = vst [vmem:[%s1759_s6 + $0x158] sm:$0xff] %v250_v43  ;;  %v254_v47 = vld [vmem:[%s1742_s3 + $0x178] sm:$0xff]  ;;  %v255_v48 = vld [vmem:[%s1742_s3 + $0x180] sm:$0xff] }
  0x6a   : > { %507 = vst [vmem:[%s1759_s6 + $0x160] sm:$0xff] %v251_v44  ;;  %508 = vst [vmem:[%s1759_s6 + $0x168] sm:$0xff] %v252_v45  ;;  %v256_v49 = vld [vmem:[%s1742_s3 + $0x188] sm:$0xff]  ;;  %v257_v50 = vld [vmem:[%s1742_s3 + $0x190] sm:$0xff] }
  0x6b   : > { %509 = vst [vmem:[%s1759_s6 + $0x170] sm:$0xff] %v253_v46  ;;  %510 = vst [vmem:[%s1759_s6 + $0x178] sm:$0xff] %v254_v47  ;;  %v258_v51 = vld [vmem:[%s1742_s3 + $0x198] sm:$0xff]  ;;  %v259_v52 = vld [vmem:[%s1742_s3 + $0x1a0] sm:$0xff] }
  0x6c   : > { %511 = vst [vmem:[%s1759_s6 + $0x180] sm:$0xff] %v255_v48  ;;  %512 = vst [vmem:[%s1759_s6 + $0x188] sm:$0xff] %v256_v49  ;;  %v260_v53 = vld [vmem:[%s1742_s3 + $0x1a8] sm:$0xff]  ;;  %v261_v54 = vld [vmem:[%s1742_s3 + $0x1b0] sm:$0xff] }
  0x6d   : > { %513 = vst [vmem:[%s1759_s6 + $0x190] sm:$0xff] %v257_v50  ;;  %514 = vst [vmem:[%s1759_s6 + $0x198] sm:$0xff] %v258_v51  ;;  %v262_v55 = vld [vmem:[%s1742_s3 + $0x1b8] sm:$0xff]  ;;  %v263_v56 = vld [vmem:[%s1742_s3 + $0x1c0] sm:$0xff] }
  0x6e   : > { %515 = vst [vmem:[%s1759_s6 + $0x1a0] sm:$0xff] %v259_v52  ;;  %516 = vst [vmem:[%s1759_s6 + $0x1a8] sm:$0xff] %v260_v53  ;;  %v264_v57 = vld [vmem:[%s1742_s3 + $0x1c8] sm:$0xff]  ;;  %v265_v58 = vld [vmem:[%s1742_s3 + $0x1d0] sm:$0xff] }
  0x6f   : > { %517 = vst [vmem:[%s1759_s6 + $0x1b0] sm:$0xff] %v261_v54  ;;  %518 = vst [vmem:[%s1759_s6 + $0x1b8] sm:$0xff] %v262_v55  ;;  %v266_v59 = vld [vmem:[%s1742_s3 + $0x1d8] sm:$0xff]  ;;  %v267_v60 = vld [vmem:[%s1742_s3 + $0x1e0] sm:$0xff] }
  0x70   : > { %519 = vst [vmem:[%s1759_s6 + $0x1c0] sm:$0xff] %v263_v56  ;;  %520 = vst [vmem:[%s1759_s6 + $0x1c8] sm:$0xff] %v264_v57  ;;  %v268_v61 = vld [vmem:[%s1742_s3 + $0x1e8] sm:$0xff]  ;;  %v269_v62 = vld [vmem:[%s1742_s3 + $0x1f0] sm:$0xff] }
  0x71   : > { %521 = vst [vmem:[%s1759_s6 + $0x1d0] sm:$0xff] %v265_v58  ;;  %522 = vst [vmem:[%s1759_s6 + $0x1d8] sm:$0xff] %v266_v59  ;;  %v270_v63 = vld [vmem:[%s1742_s3 + $0x1f8] sm:$0xff]  ;;  %v271_v0 = vld [vmem:[%s1742_s3 + $0x200] sm:$0xff] }
  0x72   : > { %523 = vst [vmem:[%s1759_s6 + $0x1e0] sm:$0xff] %v267_v60  ;;  %524 = vst [vmem:[%s1759_s6 + $0x1e8] sm:$0xff] %v268_v61  ;;  %v272_v1 = vld [vmem:[%s1742_s3 + $0x208] sm:$0xff]  ;;  %v273_v2 = vld [vmem:[%s1742_s3 + $0x210] sm:$0xff] }
  0x73   : > { %525 = vst [vmem:[%s1759_s6 + $0x1f0] sm:$0xff] %v269_v62  ;;  %526 = vst [vmem:[%s1759_s6 + $0x1f8] sm:$0xff] %v270_v63  ;;  %v274_v3 = vld [vmem:[%s1742_s3 + $0x218] sm:$0xff]  ;;  %v275_v4 = vld [vmem:[%s1742_s3 + $0x220] sm:$0xff] }
  0x74   : > { %527 = vst [vmem:[%s1759_s6 + $0x400] sm:$0xff] %v271_v0  ;;  %528 = vst [vmem:[%s1759_s6 + $0x408] sm:$0xff] %v272_v1  ;;  %v276_v5 = vld [vmem:[%s1742_s3 + $0x228] sm:$0xff]  ;;  %v277_v6 = vld [vmem:[%s1742_s3 + $0x230] sm:$0xff] }
  0x75   : > { %529 = vst [vmem:[%s1759_s6 + $0x410] sm:$0xff] %v273_v2  ;;  %530 = vst [vmem:[%s1759_s6 + $0x418] sm:$0xff] %v274_v3  ;;  %v278_v7 = vld [vmem:[%s1742_s3 + $0x238] sm:$0xff]  ;;  %v279_v8 = vld [vmem:[%s1742_s3 + $0x240] sm:$0xff] }
  0x76   : > { %531 = vst [vmem:[%s1759_s6 + $0x420] sm:$0xff] %v275_v4  ;;  %532 = vst [vmem:[%s1759_s6 + $0x428] sm:$0xff] %v276_v5  ;;  %v280_v9 = vld [vmem:[%s1742_s3 + $0x248] sm:$0xff]  ;;  %v281_v10 = vld [vmem:[%s1742_s3 + $0x250] sm:$0xff] }
  0x77   : > { %533 = vst [vmem:[%s1759_s6 + $0x430] sm:$0xff] %v277_v6  ;;  %534 = vst [vmem:[%s1759_s6 + $0x438] sm:$0xff] %v278_v7  ;;  %v282_v11 = vld [vmem:[%s1742_s3 + $0x258] sm:$0xff]  ;;  %v283_v12 = vld [vmem:[%s1742_s3 + $0x260] sm:$0xff] }
  0x78   : > { %535 = vst [vmem:[%s1759_s6 + $0x440] sm:$0xff] %v279_v8  ;;  %536 = vst [vmem:[%s1759_s6 + $0x448] sm:$0xff] %v280_v9  ;;  %v284_v13 = vld [vmem:[%s1742_s3 + $0x268] sm:$0xff]  ;;  %v285_v14 = vld [vmem:[%s1742_s3 + $0x270] sm:$0xff] }
  0x79   : > { %537 = vst [vmem:[%s1759_s6 + $0x450] sm:$0xff] %v281_v10  ;;  %538 = vst [vmem:[%s1759_s6 + $0x458] sm:$0xff] %v282_v11  ;;  %v286_v15 = vld [vmem:[%s1742_s3 + $0x278] sm:$0xff]  ;;  %v287_v16 = vld [vmem:[%s1742_s3 + $0x280] sm:$0xff] }
  0x7a   : > { %539 = vst [vmem:[%s1759_s6 + $0x460] sm:$0xff] %v283_v12  ;;  %540 = vst [vmem:[%s1759_s6 + $0x468] sm:$0xff] %v284_v13  ;;  %v288_v17 = vld [vmem:[%s1742_s3 + $0x288] sm:$0xff]  ;;  %v289_v18 = vld [vmem:[%s1742_s3 + $0x290] sm:$0xff] }
  0x7b   : > { %541 = vst [vmem:[%s1759_s6 + $0x470] sm:$0xff] %v285_v14  ;;  %542 = vst [vmem:[%s1759_s6 + $0x478] sm:$0xff] %v286_v15  ;;  %v290_v19 = vld [vmem:[%s1742_s3 + $0x298] sm:$0xff]  ;;  %v291_v20 = vld [vmem:[%s1742_s3 + $0x2a0] sm:$0xff] }
  0x7c   : > { %543 = vst [vmem:[%s1759_s6 + $0x480] sm:$0xff] %v287_v16  ;;  %544 = vst [vmem:[%s1759_s6 + $0x488] sm:$0xff] %v288_v17  ;;  %v292_v21 = vld [vmem:[%s1742_s3 + $0x2a8] sm:$0xff]  ;;  %v293_v22 = vld [vmem:[%s1742_s3 + $0x2b0] sm:$0xff] }
  0x7d   : > { %545 = vst [vmem:[%s1759_s6 + $0x490] sm:$0xff] %v289_v18  ;;  %546 = vst [vmem:[%s1759_s6 + $0x498] sm:$0xff] %v290_v19  ;;  %v294_v23 = vld [vmem:[%s1742_s3 + $0x2b8] sm:$0xff]  ;;  %v295_v24 = vld [vmem:[%s1742_s3 + $0x2c0] sm:$0xff] }
  0x7e   : > { %547 = vst [vmem:[%s1759_s6 + $0x4a0] sm:$0xff] %v291_v20  ;;  %548 = vst [vmem:[%s1759_s6 + $0x4a8] sm:$0xff] %v292_v21  ;;  %v296_v25 = vld [vmem:[%s1742_s3 + $0x2c8] sm:$0xff]  ;;  %v297_v26 = vld [vmem:[%s1742_s3 + $0x2d0] sm:$0xff] }
  0x7f   : > { %549 = vst [vmem:[%s1759_s6 + $0x4b0] sm:$0xff] %v293_v22  ;;  %550 = vst [vmem:[%s1759_s6 + $0x4b8] sm:$0xff] %v294_v23  ;;  %v298_v27 = vld [vmem:[%s1742_s3 + $0x2d8] sm:$0xff]  ;;  %v299_v28 = vld [vmem:[%s1742_s3 + $0x2e0] sm:$0xff] }
  0x80   : > { %551 = vst [vmem:[%s1759_s6 + $0x4c0] sm:$0xff] %v295_v24  ;;  %552 = vst [vmem:[%s1759_s6 + $0x4c8] sm:$0xff] %v296_v25  ;;  %v300_v29 = vld [vmem:[%s1742_s3 + $0x2e8] sm:$0xff]  ;;  %v301_v30 = vld [vmem:[%s1742_s3 + $0x2f0] sm:$0xff] }
  0x81   : > { %553 = vst [vmem:[%s1759_s6 + $0x4d0] sm:$0xff] %v297_v26  ;;  %554 = vst [vmem:[%s1759_s6 + $0x4d8] sm:$0xff] %v298_v27  ;;  %v302_v31 = vld [vmem:[%s1742_s3 + $0x2f8] sm:$0xff]  ;;  %v303_v32 = vld [vmem:[%s1742_s3 + $0x300] sm:$0xff] }
  0x82   : > { %555 = vst [vmem:[%s1759_s6 + $0x4e0] sm:$0xff] %v299_v28  ;;  %556 = vst [vmem:[%s1759_s6 + $0x4e8] sm:$0xff] %v300_v29  ;;  %v304_v33 = vld [vmem:[%s1742_s3 + $0x308] sm:$0xff]  ;;  %v305_v34 = vld [vmem:[%s1742_s3 + $0x310] sm:$0xff] }
  0x83   : > { %557 = vst [vmem:[%s1759_s6 + $0x4f0] sm:$0xff] %v301_v30  ;;  %558 = vst [vmem:[%s1759_s6 + $0x4f8] sm:$0xff] %v302_v31  ;;  %v306_v35 = vld [vmem:[%s1742_s3 + $0x318] sm:$0xff]  ;;  %v307_v36 = vld [vmem:[%s1742_s3 + $0x320] sm:$0xff] }
  0x84   : > { %559 = vst [vmem:[%s1759_s6 + $0x500] sm:$0xff] %v303_v32  ;;  %560 = vst [vmem:[%s1759_s6 + $0x508] sm:$0xff] %v304_v33  ;;  %v308_v37 = vld [vmem:[%s1742_s3 + $0x328] sm:$0xff]  ;;  %v309_v38 = vld [vmem:[%s1742_s3 + $0x330] sm:$0xff] }
  0x85   : > { %561 = vst [vmem:[%s1759_s6 + $0x510] sm:$0xff] %v305_v34  ;;  %562 = vst [vmem:[%s1759_s6 + $0x518] sm:$0xff] %v306_v35  ;;  %v310_v39 = vld [vmem:[%s1742_s3 + $0x338] sm:$0xff]  ;;  %v311_v40 = vld [vmem:[%s1742_s3 + $0x340] sm:$0xff] }
  0x86   : > { %563 = vst [vmem:[%s1759_s6 + $0x520] sm:$0xff] %v307_v36  ;;  %564 = vst [vmem:[%s1759_s6 + $0x528] sm:$0xff] %v308_v37  ;;  %v312_v41 = vld [vmem:[%s1742_s3 + $0x348] sm:$0xff]  ;;  %v313_v42 = vld [vmem:[%s1742_s3 + $0x350] sm:$0xff] }
  0x87   : > { %565 = vst [vmem:[%s1759_s6 + $0x530] sm:$0xff] %v309_v38  ;;  %566 = vst [vmem:[%s1759_s6 + $0x538] sm:$0xff] %v310_v39  ;;  %v314_v43 = vld [vmem:[%s1742_s3 + $0x358] sm:$0xff]  ;;  %v315_v44 = vld [vmem:[%s1742_s3 + $0x360] sm:$0xff] }
  0x88   : > { %567 = vst [vmem:[%s1759_s6 + $0x540] sm:$0xff] %v311_v40  ;;  %568 = vst [vmem:[%s1759_s6 + $0x548] sm:$0xff] %v312_v41  ;;  %v316_v45 = vld [vmem:[%s1742_s3 + $0x368] sm:$0xff]  ;;  %v317_v46 = vld [vmem:[%s1742_s3 + $0x370] sm:$0xff] }
  0x89   : > { %569 = vst [vmem:[%s1759_s6 + $0x550] sm:$0xff] %v313_v42  ;;  %570 = vst [vmem:[%s1759_s6 + $0x558] sm:$0xff] %v314_v43  ;;  %v318_v47 = vld [vmem:[%s1742_s3 + $0x378] sm:$0xff]  ;;  %v319_v48 = vld [vmem:[%s1742_s3 + $0x380] sm:$0xff] }
  0x8a   : > { %571 = vst [vmem:[%s1759_s6 + $0x560] sm:$0xff] %v315_v44  ;;  %572 = vst [vmem:[%s1759_s6 + $0x568] sm:$0xff] %v316_v45  ;;  %v320_v49 = vld [vmem:[%s1742_s3 + $0x388] sm:$0xff]  ;;  %v321_v50 = vld [vmem:[%s1742_s3 + $0x390] sm:$0xff] }
  0x8b   : > { %573 = vst [vmem:[%s1759_s6 + $0x570] sm:$0xff] %v317_v46  ;;  %574 = vst [vmem:[%s1759_s6 + $0x578] sm:$0xff] %v318_v47  ;;  %v322_v51 = vld [vmem:[%s1742_s3 + $0x398] sm:$0xff]  ;;  %v323_v52 = vld [vmem:[%s1742_s3 + $0x3a0] sm:$0xff] }
  0x8c   : > { %575 = vst [vmem:[%s1759_s6 + $0x580] sm:$0xff] %v319_v48  ;;  %576 = vst [vmem:[%s1759_s6 + $0x588] sm:$0xff] %v320_v49  ;;  %v324_v53 = vld [vmem:[%s1742_s3 + $0x3a8] sm:$0xff]  ;;  %v325_v54 = vld [vmem:[%s1742_s3 + $0x3b0] sm:$0xff] }
  0x8d   : > { %577 = vst [vmem:[%s1759_s6 + $0x590] sm:$0xff] %v321_v50  ;;  %578 = vst [vmem:[%s1759_s6 + $0x598] sm:$0xff] %v322_v51  ;;  %v326_v55 = vld [vmem:[%s1742_s3 + $0x3b8] sm:$0xff]  ;;  %v327_v56 = vld [vmem:[%s1742_s3 + $0x3c0] sm:$0xff] }
  0x8e   : > { %579 = vst [vmem:[%s1759_s6 + $0x5a0] sm:$0xff] %v323_v52  ;;  %580 = vst [vmem:[%s1759_s6 + $0x5a8] sm:$0xff] %v324_v53  ;;  %v328_v57 = vld [vmem:[%s1742_s3 + $0x3c8] sm:$0xff]  ;;  %v329_v58 = vld [vmem:[%s1742_s3 + $0x3d0] sm:$0xff] }
  0x8f   : > { %581 = vst [vmem:[%s1759_s6 + $0x5b0] sm:$0xff] %v325_v54  ;;  %582 = vst [vmem:[%s1759_s6 + $0x5b8] sm:$0xff] %v326_v55  ;;  %v330_v59 = vld [vmem:[%s1742_s3 + $0x3d8] sm:$0xff]  ;;  %v331_v60 = vld [vmem:[%s1742_s3 + $0x3e0] sm:$0xff] }
  0x90   : > { %583 = vst [vmem:[%s1759_s6 + $0x5c0] sm:$0xff] %v327_v56  ;;  %584 = vst [vmem:[%s1759_s6 + $0x5c8] sm:$0xff] %v328_v57  ;;  %v332_v61 = vld [vmem:[%s1742_s3 + $0x3e8] sm:$0xff]  ;;  %v333_v62 = vld [vmem:[%s1742_s3 + $0x3f0] sm:$0xff] }
  0x91   : > { %585 = vst [vmem:[%s1759_s6 + $0x5d0] sm:$0xff] %v329_v58  ;;  %586 = vst [vmem:[%s1759_s6 + $0x5d8] sm:$0xff] %v330_v59  ;;  %v334_v63 = vld [vmem:[%s1742_s3 + $0x3f8] sm:$0xff]  ;;  %v335_v0 = vld [vmem:[%s1742_s3 + $0x400] sm:$0xff] }
  0x92   : > { %587 = vst [vmem:[%s1759_s6 + $0x5e0] sm:$0xff] %v331_v60  ;;  %588 = vst [vmem:[%s1759_s6 + $0x5e8] sm:$0xff] %v332_v61  ;;  %v336_v1 = vld [vmem:[%s1742_s3 + $0x408] sm:$0xff]  ;;  %v337_v2 = vld [vmem:[%s1742_s3 + $0x410] sm:$0xff] }
  0x93   : > { %589 = vst [vmem:[%s1759_s6 + $0x5f0] sm:$0xff] %v333_v62  ;;  %590 = vst [vmem:[%s1759_s6 + $0x5f8] sm:$0xff] %v334_v63  ;;  %v338_v3 = vld [vmem:[%s1742_s3 + $0x418] sm:$0xff]  ;;  %v339_v4 = vld [vmem:[%s1742_s3 + $0x420] sm:$0xff] }
  0x94   : > { %591 = vst [vmem:[%s1759_s6 + $0x800] sm:$0xff] %v335_v0  ;;  %592 = vst [vmem:[%s1759_s6 + $0x808] sm:$0xff] %v336_v1  ;;  %v340_v5 = vld [vmem:[%s1742_s3 + $0x428] sm:$0xff]  ;;  %v341_v6 = vld [vmem:[%s1742_s3 + $0x430] sm:$0xff] }
  0x95   : > { %593 = vst [vmem:[%s1759_s6 + $0x810] sm:$0xff] %v337_v2  ;;  %594 = vst [vmem:[%s1759_s6 + $0x818] sm:$0xff] %v338_v3  ;;  %v342_v7 = vld [vmem:[%s1742_s3 + $0x438] sm:$0xff]  ;;  %v343_v8 = vld [vmem:[%s1742_s3 + $0x440] sm:$0xff] }
  0x96   : > { %595 = vst [vmem:[%s1759_s6 + $0x820] sm:$0xff] %v339_v4  ;;  %596 = vst [vmem:[%s1759_s6 + $0x828] sm:$0xff] %v340_v5  ;;  %v344_v9 = vld [vmem:[%s1742_s3 + $0x448] sm:$0xff]  ;;  %v345_v10 = vld [vmem:[%s1742_s3 + $0x450] sm:$0xff] }
  0x97   : > { %597 = vst [vmem:[%s1759_s6 + $0x830] sm:$0xff] %v341_v6  ;;  %598 = vst [vmem:[%s1759_s6 + $0x838] sm:$0xff] %v342_v7  ;;  %v346_v11 = vld [vmem:[%s1742_s3 + $0x458] sm:$0xff]  ;;  %v347_v12 = vld [vmem:[%s1742_s3 + $0x460] sm:$0xff] }
  0x98   : > { %599 = vst [vmem:[%s1759_s6 + $0x840] sm:$0xff] %v343_v8  ;;  %600 = vst [vmem:[%s1759_s6 + $0x848] sm:$0xff] %v344_v9  ;;  %v348_v13 = vld [vmem:[%s1742_s3 + $0x468] sm:$0xff]  ;;  %v349_v14 = vld [vmem:[%s1742_s3 + $0x470] sm:$0xff] }
  0x99   : > { %601 = vst [vmem:[%s1759_s6 + $0x850] sm:$0xff] %v345_v10  ;;  %602 = vst [vmem:[%s1759_s6 + $0x858] sm:$0xff] %v346_v11  ;;  %v350_v15 = vld [vmem:[%s1742_s3 + $0x478] sm:$0xff]  ;;  %v351_v16 = vld [vmem:[%s1742_s3 + $0x480] sm:$0xff] }
  0x9a   : > { %603 = vst [vmem:[%s1759_s6 + $0x860] sm:$0xff] %v347_v12  ;;  %604 = vst [vmem:[%s1759_s6 + $0x868] sm:$0xff] %v348_v13  ;;  %v352_v17 = vld [vmem:[%s1742_s3 + $0x488] sm:$0xff]  ;;  %v353_v18 = vld [vmem:[%s1742_s3 + $0x490] sm:$0xff] }
  0x9b   : > { %605 = vst [vmem:[%s1759_s6 + $0x870] sm:$0xff] %v349_v14  ;;  %606 = vst [vmem:[%s1759_s6 + $0x878] sm:$0xff] %v350_v15  ;;  %v354_v19 = vld [vmem:[%s1742_s3 + $0x498] sm:$0xff]  ;;  %v355_v20 = vld [vmem:[%s1742_s3 + $0x4a0] sm:$0xff] }
  0x9c   : > { %607 = vst [vmem:[%s1759_s6 + $0x880] sm:$0xff] %v351_v16  ;;  %608 = vst [vmem:[%s1759_s6 + $0x888] sm:$0xff] %v352_v17  ;;  %v356_v21 = vld [vmem:[%s1742_s3 + $0x4a8] sm:$0xff]  ;;  %v357_v22 = vld [vmem:[%s1742_s3 + $0x4b0] sm:$0xff] }
  0x9d   : > { %609 = vst [vmem:[%s1759_s6 + $0x890] sm:$0xff] %v353_v18  ;;  %610 = vst [vmem:[%s1759_s6 + $0x898] sm:$0xff] %v354_v19  ;;  %v358_v23 = vld [vmem:[%s1742_s3 + $0x4b8] sm:$0xff]  ;;  %v359_v24 = vld [vmem:[%s1742_s3 + $0x4c0] sm:$0xff] }
  0x9e   : > { %611 = vst [vmem:[%s1759_s6 + $0x8a0] sm:$0xff] %v355_v20  ;;  %612 = vst [vmem:[%s1759_s6 + $0x8a8] sm:$0xff] %v356_v21  ;;  %v360_v25 = vld [vmem:[%s1742_s3 + $0x4c8] sm:$0xff]  ;;  %v361_v26 = vld [vmem:[%s1742_s3 + $0x4d0] sm:$0xff] }
  0x9f   : > { %613 = vst [vmem:[%s1759_s6 + $0x8b0] sm:$0xff] %v357_v22  ;;  %614 = vst [vmem:[%s1759_s6 + $0x8b8] sm:$0xff] %v358_v23  ;;  %v362_v27 = vld [vmem:[%s1742_s3 + $0x4d8] sm:$0xff]  ;;  %v363_v28 = vld [vmem:[%s1742_s3 + $0x4e0] sm:$0xff] }
  0xa0   : > { %615 = vst [vmem:[%s1759_s6 + $0x8c0] sm:$0xff] %v359_v24  ;;  %616 = vst [vmem:[%s1759_s6 + $0x8c8] sm:$0xff] %v360_v25  ;;  %v364_v29 = vld [vmem:[%s1742_s3 + $0x4e8] sm:$0xff]  ;;  %v365_v30 = vld [vmem:[%s1742_s3 + $0x4f0] sm:$0xff] }
  0xa1   : > { %617 = vst [vmem:[%s1759_s6 + $0x8d0] sm:$0xff] %v361_v26  ;;  %618 = vst [vmem:[%s1759_s6 + $0x8d8] sm:$0xff] %v362_v27  ;;  %v366_v31 = vld [vmem:[%s1742_s3 + $0x4f8] sm:$0xff]  ;;  %v367_v32 = vld [vmem:[%s1742_s3 + $0x500] sm:$0xff] }
  0xa2   : > { %619 = vst [vmem:[%s1759_s6 + $0x8e0] sm:$0xff] %v363_v28  ;;  %620 = vst [vmem:[%s1759_s6 + $0x8e8] sm:$0xff] %v364_v29  ;;  %v368_v33 = vld [vmem:[%s1742_s3 + $0x508] sm:$0xff]  ;;  %v369_v34 = vld [vmem:[%s1742_s3 + $0x510] sm:$0xff] }
  0xa3   : > { %621 = vst [vmem:[%s1759_s6 + $0x8f0] sm:$0xff] %v365_v30  ;;  %622 = vst [vmem:[%s1759_s6 + $0x8f8] sm:$0xff] %v366_v31  ;;  %v370_v35 = vld [vmem:[%s1742_s3 + $0x518] sm:$0xff]  ;;  %v371_v36 = vld [vmem:[%s1742_s3 + $0x520] sm:$0xff] }
  0xa4   : > { %623 = vst [vmem:[%s1759_s6 + $0x900] sm:$0xff] %v367_v32  ;;  %624 = vst [vmem:[%s1759_s6 + $0x908] sm:$0xff] %v368_v33  ;;  %v372_v37 = vld [vmem:[%s1742_s3 + $0x528] sm:$0xff]  ;;  %v373_v38 = vld [vmem:[%s1742_s3 + $0x530] sm:$0xff] }
  0xa5   : > { %625 = vst [vmem:[%s1759_s6 + $0x910] sm:$0xff] %v369_v34  ;;  %626 = vst [vmem:[%s1759_s6 + $0x918] sm:$0xff] %v370_v35  ;;  %v374_v39 = vld [vmem:[%s1742_s3 + $0x538] sm:$0xff]  ;;  %v375_v40 = vld [vmem:[%s1742_s3 + $0x540] sm:$0xff] }
  0xa6   : > { %627 = vst [vmem:[%s1759_s6 + $0x920] sm:$0xff] %v371_v36  ;;  %628 = vst [vmem:[%s1759_s6 + $0x928] sm:$0xff] %v372_v37  ;;  %v376_v41 = vld [vmem:[%s1742_s3 + $0x548] sm:$0xff]  ;;  %v377_v42 = vld [vmem:[%s1742_s3 + $0x550] sm:$0xff] }
  0xa7   : > { %629 = vst [vmem:[%s1759_s6 + $0x930] sm:$0xff] %v373_v38  ;;  %630 = vst [vmem:[%s1759_s6 + $0x938] sm:$0xff] %v374_v39  ;;  %v378_v43 = vld [vmem:[%s1742_s3 + $0x558] sm:$0xff]  ;;  %v379_v44 = vld [vmem:[%s1742_s3 + $0x560] sm:$0xff] }
  0xa8   : > { %631 = vst [vmem:[%s1759_s6 + $0x940] sm:$0xff] %v375_v40  ;;  %632 = vst [vmem:[%s1759_s6 + $0x948] sm:$0xff] %v376_v41  ;;  %v380_v45 = vld [vmem:[%s1742_s3 + $0x568] sm:$0xff]  ;;  %v381_v46 = vld [vmem:[%s1742_s3 + $0x570] sm:$0xff] }
  0xa9   : > { %633 = vst [vmem:[%s1759_s6 + $0x950] sm:$0xff] %v377_v42  ;;  %634 = vst [vmem:[%s1759_s6 + $0x958] sm:$0xff] %v378_v43  ;;  %v382_v47 = vld [vmem:[%s1742_s3 + $0x578] sm:$0xff]  ;;  %v383_v48 = vld [vmem:[%s1742_s3 + $0x580] sm:$0xff] }
  0xaa   : > { %635 = vst [vmem:[%s1759_s6 + $0x960] sm:$0xff] %v379_v44  ;;  %636 = vst [vmem:[%s1759_s6 + $0x968] sm:$0xff] %v380_v45  ;;  %v384_v49 = vld [vmem:[%s1742_s3 + $0x588] sm:$0xff]  ;;  %v385_v50 = vld [vmem:[%s1742_s3 + $0x590] sm:$0xff] }
  0xab   : > { %637 = vst [vmem:[%s1759_s6 + $0x970] sm:$0xff] %v381_v46  ;;  %638 = vst [vmem:[%s1759_s6 + $0x978] sm:$0xff] %v382_v47  ;;  %v386_v51 = vld [vmem:[%s1742_s3 + $0x598] sm:$0xff]  ;;  %v387_v52 = vld [vmem:[%s1742_s3 + $0x5a0] sm:$0xff] }
  0xac   : > { %639 = vst [vmem:[%s1759_s6 + $0x980] sm:$0xff] %v383_v48  ;;  %640 = vst [vmem:[%s1759_s6 + $0x988] sm:$0xff] %v384_v49  ;;  %v388_v53 = vld [vmem:[%s1742_s3 + $0x5a8] sm:$0xff]  ;;  %v389_v54 = vld [vmem:[%s1742_s3 + $0x5b0] sm:$0xff] }
  0xad   : > { %641 = vst [vmem:[%s1759_s6 + $0x990] sm:$0xff] %v385_v50  ;;  %642 = vst [vmem:[%s1759_s6 + $0x998] sm:$0xff] %v386_v51  ;;  %v390_v55 = vld [vmem:[%s1742_s3 + $0x5b8] sm:$0xff]  ;;  %v391_v56 = vld [vmem:[%s1742_s3 + $0x5c0] sm:$0xff] }
  0xae   : > { %643 = vst [vmem:[%s1759_s6 + $0x9a0] sm:$0xff] %v387_v52  ;;  %644 = vst [vmem:[%s1759_s6 + $0x9a8] sm:$0xff] %v388_v53  ;;  %v392_v57 = vld [vmem:[%s1742_s3 + $0x5c8] sm:$0xff]  ;;  %v393_v58 = vld [vmem:[%s1742_s3 + $0x5d0] sm:$0xff] }
  0xaf   : > { %645 = vst [vmem:[%s1759_s6 + $0x9b0] sm:$0xff] %v389_v54  ;;  %646 = vst [vmem:[%s1759_s6 + $0x9b8] sm:$0xff] %v390_v55  ;;  %v394_v59 = vld [vmem:[%s1742_s3 + $0x5d8] sm:$0xff]  ;;  %v395_v60 = vld [vmem:[%s1742_s3 + $0x5e0] sm:$0xff] }
  0xb0   : > { %647 = vst [vmem:[%s1759_s6 + $0x9c0] sm:$0xff] %v391_v56  ;;  %648 = vst [vmem:[%s1759_s6 + $0x9c8] sm:$0xff] %v392_v57  ;;  %v396_v61 = vld [vmem:[%s1742_s3 + $0x5e8] sm:$0xff]  ;;  %v397_v62 = vld [vmem:[%s1742_s3 + $0x5f0] sm:$0xff] }
  0xb1   : > { %649 = vst [vmem:[%s1759_s6 + $0x9d0] sm:$0xff] %v393_v58  ;;  %650 = vst [vmem:[%s1759_s6 + $0x9d8] sm:$0xff] %v394_v59  ;;  %v398_v63 = vld [vmem:[%s1742_s3 + $0x5f8] sm:$0xff]  ;;  %v399_v0 = vld [vmem:[%s1742_s3 + $0x600] sm:$0xff] }
  0xb2   : > { %651 = vst [vmem:[%s1759_s6 + $0x9e0] sm:$0xff] %v395_v60  ;;  %652 = vst [vmem:[%s1759_s6 + $0x9e8] sm:$0xff] %v396_v61  ;;  %v400_v1 = vld [vmem:[%s1742_s3 + $0x608] sm:$0xff]  ;;  %v401_v2 = vld [vmem:[%s1742_s3 + $0x610] sm:$0xff] }
  0xb3   : > { %653 = vst [vmem:[%s1759_s6 + $0x9f0] sm:$0xff] %v397_v62  ;;  %654 = vst [vmem:[%s1759_s6 + $0x9f8] sm:$0xff] %v398_v63  ;;  %v402_v3 = vld [vmem:[%s1742_s3 + $0x618] sm:$0xff]  ;;  %v403_v4 = vld [vmem:[%s1742_s3 + $0x620] sm:$0xff] }
  0xb4   : > { %655 = vst [vmem:[%s1759_s6 + $0xc00] sm:$0xff] %v399_v0  ;;  %656 = vst [vmem:[%s1759_s6 + $0xc08] sm:$0xff] %v400_v1  ;;  %v404_v5 = vld [vmem:[%s1742_s3 + $0x628] sm:$0xff]  ;;  %v405_v6 = vld [vmem:[%s1742_s3 + $0x630] sm:$0xff] }
  0xb5   : > { %657 = vst [vmem:[%s1759_s6 + $0xc10] sm:$0xff] %v401_v2  ;;  %658 = vst [vmem:[%s1759_s6 + $0xc18] sm:$0xff] %v402_v3  ;;  %v406_v7 = vld [vmem:[%s1742_s3 + $0x638] sm:$0xff]  ;;  %v407_v8 = vld [vmem:[%s1742_s3 + $0x640] sm:$0xff] }
  0xb6   : > { %659 = vst [vmem:[%s1759_s6 + $0xc20] sm:$0xff] %v403_v4  ;;  %660 = vst [vmem:[%s1759_s6 + $0xc28] sm:$0xff] %v404_v5  ;;  %v408_v9 = vld [vmem:[%s1742_s3 + $0x648] sm:$0xff]  ;;  %v409_v10 = vld [vmem:[%s1742_s3 + $0x650] sm:$0xff] }
  0xb7   : > { %661 = vst [vmem:[%s1759_s6 + $0xc30] sm:$0xff] %v405_v6  ;;  %662 = vst [vmem:[%s1759_s6 + $0xc38] sm:$0xff] %v406_v7  ;;  %v410_v11 = vld [vmem:[%s1742_s3 + $0x658] sm:$0xff]  ;;  %v411_v12 = vld [vmem:[%s1742_s3 + $0x660] sm:$0xff] }
  0xb8   : > { %663 = vst [vmem:[%s1759_s6 + $0xc40] sm:$0xff] %v407_v8  ;;  %664 = vst [vmem:[%s1759_s6 + $0xc48] sm:$0xff] %v408_v9  ;;  %v412_v13 = vld [vmem:[%s1742_s3 + $0x668] sm:$0xff]  ;;  %v413_v14 = vld [vmem:[%s1742_s3 + $0x670] sm:$0xff] }
  0xb9   : > { %665 = vst [vmem:[%s1759_s6 + $0xc50] sm:$0xff] %v409_v10  ;;  %666 = vst [vmem:[%s1759_s6 + $0xc58] sm:$0xff] %v410_v11  ;;  %v414_v15 = vld [vmem:[%s1742_s3 + $0x678] sm:$0xff]  ;;  %v415_v16 = vld [vmem:[%s1742_s3 + $0x680] sm:$0xff] }
  0xba   : > { %667 = vst [vmem:[%s1759_s6 + $0xc60] sm:$0xff] %v411_v12  ;;  %668 = vst [vmem:[%s1759_s6 + $0xc68] sm:$0xff] %v412_v13  ;;  %v416_v17 = vld [vmem:[%s1742_s3 + $0x688] sm:$0xff]  ;;  %v417_v18 = vld [vmem:[%s1742_s3 + $0x690] sm:$0xff] }
  0xbb   : > { %669 = vst [vmem:[%s1759_s6 + $0xc70] sm:$0xff] %v413_v14  ;;  %670 = vst [vmem:[%s1759_s6 + $0xc78] sm:$0xff] %v414_v15  ;;  %v418_v19 = vld [vmem:[%s1742_s3 + $0x698] sm:$0xff]  ;;  %v419_v20 = vld [vmem:[%s1742_s3 + $0x6a0] sm:$0xff] }
  0xbc   : > { %671 = vst [vmem:[%s1759_s6 + $0xc80] sm:$0xff] %v415_v16  ;;  %672 = vst [vmem:[%s1759_s6 + $0xc88] sm:$0xff] %v416_v17  ;;  %v420_v21 = vld [vmem:[%s1742_s3 + $0x6a8] sm:$0xff]  ;;  %v421_v22 = vld [vmem:[%s1742_s3 + $0x6b0] sm:$0xff] }
  0xbd   : > { %673 = vst [vmem:[%s1759_s6 + $0xc90] sm:$0xff] %v417_v18  ;;  %674 = vst [vmem:[%s1759_s6 + $0xc98] sm:$0xff] %v418_v19  ;;  %v422_v23 = vld [vmem:[%s1742_s3 + $0x6b8] sm:$0xff]  ;;  %v423_v24 = vld [vmem:[%s1742_s3 + $0x6c0] sm:$0xff] }
  0xbe   : > { %675 = vst [vmem:[%s1759_s6 + $0xca0] sm:$0xff] %v419_v20  ;;  %676 = vst [vmem:[%s1759_s6 + $0xca8] sm:$0xff] %v420_v21  ;;  %v424_v25 = vld [vmem:[%s1742_s3 + $0x6c8] sm:$0xff]  ;;  %v425_v26 = vld [vmem:[%s1742_s3 + $0x6d0] sm:$0xff] }
  0xbf   : > { %677 = vst [vmem:[%s1759_s6 + $0xcb0] sm:$0xff] %v421_v22  ;;  %678 = vst [vmem:[%s1759_s6 + $0xcb8] sm:$0xff] %v422_v23  ;;  %v426_v27 = vld [vmem:[%s1742_s3 + $0x6d8] sm:$0xff]  ;;  %v427_v28 = vld [vmem:[%s1742_s3 + $0x6e0] sm:$0xff] }
  0xc0   : > { %679 = vst [vmem:[%s1759_s6 + $0xcc0] sm:$0xff] %v423_v24  ;;  %680 = vst [vmem:[%s1759_s6 + $0xcc8] sm:$0xff] %v424_v25  ;;  %v428_v29 = vld [vmem:[%s1742_s3 + $0x6e8] sm:$0xff]  ;;  %v429_v30 = vld [vmem:[%s1742_s3 + $0x6f0] sm:$0xff] }
  0xc1   : > { %681 = vst [vmem:[%s1759_s6 + $0xcd0] sm:$0xff] %v425_v26  ;;  %682 = vst [vmem:[%s1759_s6 + $0xcd8] sm:$0xff] %v426_v27  ;;  %v430_v31 = vld [vmem:[%s1742_s3 + $0x6f8] sm:$0xff]  ;;  %v431_v32 = vld [vmem:[%s1742_s3 + $0x700] sm:$0xff] }
  0xc2   : > { %683 = vst [vmem:[%s1759_s6 + $0xce0] sm:$0xff] %v427_v28  ;;  %684 = vst [vmem:[%s1759_s6 + $0xce8] sm:$0xff] %v428_v29  ;;  %v432_v33 = vld [vmem:[%s1742_s3 + $0x708] sm:$0xff]  ;;  %v433_v34 = vld [vmem:[%s1742_s3 + $0x710] sm:$0xff] }
  0xc3   : > { %685 = vst [vmem:[%s1759_s6 + $0xcf0] sm:$0xff] %v429_v30  ;;  %686 = vst [vmem:[%s1759_s6 + $0xcf8] sm:$0xff] %v430_v31  ;;  %v434_v35 = vld [vmem:[%s1742_s3 + $0x718] sm:$0xff]  ;;  %v435_v36 = vld [vmem:[%s1742_s3 + $0x720] sm:$0xff] }
  0xc4   : > { %687 = vst [vmem:[%s1759_s6 + $0xd00] sm:$0xff] %v431_v32  ;;  %688 = vst [vmem:[%s1759_s6 + $0xd08] sm:$0xff] %v432_v33  ;;  %v436_v37 = vld [vmem:[%s1742_s3 + $0x728] sm:$0xff]  ;;  %v437_v38 = vld [vmem:[%s1742_s3 + $0x730] sm:$0xff] }
  0xc5   : > { %689 = vst [vmem:[%s1759_s6 + $0xd10] sm:$0xff] %v433_v34  ;;  %690 = vst [vmem:[%s1759_s6 + $0xd18] sm:$0xff] %v434_v35  ;;  %v438_v39 = vld [vmem:[%s1742_s3 + $0x738] sm:$0xff]  ;;  %v439_v40 = vld [vmem:[%s1742_s3 + $0x740] sm:$0xff] }
  0xc6   : > { %691 = vst [vmem:[%s1759_s6 + $0xd20] sm:$0xff] %v435_v36  ;;  %692 = vst [vmem:[%s1759_s6 + $0xd28] sm:$0xff] %v436_v37  ;;  %v440_v41 = vld [vmem:[%s1742_s3 + $0x748] sm:$0xff]  ;;  %v441_v42 = vld [vmem:[%s1742_s3 + $0x750] sm:$0xff] }
  0xc7   : > { %693 = vst [vmem:[%s1759_s6 + $0xd30] sm:$0xff] %v437_v38  ;;  %694 = vst [vmem:[%s1759_s6 + $0xd38] sm:$0xff] %v438_v39  ;;  %v442_v43 = vld [vmem:[%s1742_s3 + $0x758] sm:$0xff]  ;;  %v443_v44 = vld [vmem:[%s1742_s3 + $0x760] sm:$0xff] }
  0xc8   : > { %695 = vst [vmem:[%s1759_s6 + $0xd40] sm:$0xff] %v439_v40  ;;  %696 = vst [vmem:[%s1759_s6 + $0xd48] sm:$0xff] %v440_v41  ;;  %v444_v45 = vld [vmem:[%s1742_s3 + $0x768] sm:$0xff]  ;;  %v445_v46 = vld [vmem:[%s1742_s3 + $0x770] sm:$0xff] }
  0xc9   : > { %697 = vst [vmem:[%s1759_s6 + $0xd50] sm:$0xff] %v441_v42  ;;  %698 = vst [vmem:[%s1759_s6 + $0xd58] sm:$0xff] %v442_v43  ;;  %v446_v47 = vld [vmem:[%s1742_s3 + $0x778] sm:$0xff]  ;;  %v447_v48 = vld [vmem:[%s1742_s3 + $0x780] sm:$0xff] }
  0xca   : > { %699 = vst [vmem:[%s1759_s6 + $0xd60] sm:$0xff] %v443_v44  ;;  %700 = vst [vmem:[%s1759_s6 + $0xd68] sm:$0xff] %v444_v45  ;;  %v448_v49 = vld [vmem:[%s1742_s3 + $0x788] sm:$0xff]  ;;  %v449_v50 = vld [vmem:[%s1742_s3 + $0x790] sm:$0xff] }
  0xcb   : > { %701 = vst [vmem:[%s1759_s6 + $0xd70] sm:$0xff] %v445_v46  ;;  %702 = vst [vmem:[%s1759_s6 + $0xd78] sm:$0xff] %v446_v47  ;;  %v450_v51 = vld [vmem:[%s1742_s3 + $0x798] sm:$0xff]  ;;  %v451_v52 = vld [vmem:[%s1742_s3 + $0x7a0] sm:$0xff] }
  0xcc   : > { %703 = vst [vmem:[%s1759_s6 + $0xd80] sm:$0xff] %v447_v48  ;;  %704 = vst [vmem:[%s1759_s6 + $0xd88] sm:$0xff] %v448_v49  ;;  %v452_v53 = vld [vmem:[%s1742_s3 + $0x7a8] sm:$0xff]  ;;  %v453_v54 = vld [vmem:[%s1742_s3 + $0x7b0] sm:$0xff] }
  0xcd   : > { %705 = vst [vmem:[%s1759_s6 + $0xd90] sm:$0xff] %v449_v50  ;;  %706 = vst [vmem:[%s1759_s6 + $0xd98] sm:$0xff] %v450_v51  ;;  %v454_v55 = vld [vmem:[%s1742_s3 + $0x7b8] sm:$0xff]  ;;  %v455_v56 = vld [vmem:[%s1742_s3 + $0x7c0] sm:$0xff] }
  0xce   : > { %707 = vst [vmem:[%s1759_s6 + $0xda0] sm:$0xff] %v451_v52  ;;  %708 = vst [vmem:[%s1759_s6 + $0xda8] sm:$0xff] %v452_v53  ;;  %v456_v57 = vld [vmem:[%s1742_s3 + $0x7c8] sm:$0xff]  ;;  %v457_v58 = vld [vmem:[%s1742_s3 + $0x7d0] sm:$0xff] }
  0xcf   : > { %709 = vst [vmem:[%s1759_s6 + $0xdb0] sm:$0xff] %v453_v54  ;;  %710 = vst [vmem:[%s1759_s6 + $0xdb8] sm:$0xff] %v454_v55  ;;  %v458_v59 = vld [vmem:[%s1742_s3 + $0x7d8] sm:$0xff]  ;;  %v459_v60 = vld [vmem:[%s1742_s3 + $0x7e0] sm:$0xff] }
  0xd0   : > { %711 = vst [vmem:[%s1759_s6 + $0xdc0] sm:$0xff] %v455_v56  ;;  %712 = vst [vmem:[%s1759_s6 + $0xdc8] sm:$0xff] %v456_v57  ;;  %v460_v61 = vld [vmem:[%s1742_s3 + $0x7e8] sm:$0xff]  ;;  %v461_v62 = vld [vmem:[%s1742_s3 + $0x7f0] sm:$0xff] }
  0xd1   : > { %713 = vst [vmem:[%s1759_s6 + $0xdd0] sm:$0xff] %v457_v58  ;;  %714 = vst [vmem:[%s1759_s6 + $0xdd8] sm:$0xff] %v458_v59  ;;  %v462_v63 = vld [vmem:[%s1742_s3 + $0x7f8] sm:$0xff]  ;;  %v719_v0 = vld [vmem:[%s1749_s29] sm:$0xff] }
  0xd2   : > { %715 = vst [vmem:[%s1759_s6 + $0xde0] sm:$0xff] %v459_v60  ;;  %716 = vst [vmem:[%s1759_s6 + $0xde8] sm:$0xff] %v460_v61  ;;  %v720_v1 = vld [vmem:[%s1749_s29 + $0x8] sm:$0xff]  ;;  %v721_v2 = vld [vmem:[%s1749_s29 + $0x10] sm:$0xff] }
  0xd3   : > { %717 = vst [vmem:[%s1759_s6 + $0xdf0] sm:$0xff] %v461_v62  ;;  %718 = vst [vmem:[%s1759_s6 + $0xdf8] sm:$0xff] %v462_v63  ;;  %v722_v3 = vld [vmem:[%s1749_s29 + $0x18] sm:$0xff]  ;;  %v723_v4 = vld [vmem:[%s1749_s29 + $0x20] sm:$0xff] }
  0xd4   : > { %975 = vst [vmem:[%s1759_s6 + $0x200] sm:$0xff] %v719_v0  ;;  %976 = vst [vmem:[%s1759_s6 + $0x208] sm:$0xff] %v720_v1  ;;  %v724_v5 = vld [vmem:[%s1749_s29 + $0x28] sm:$0xff]  ;;  %v725_v6 = vld [vmem:[%s1749_s29 + $0x30] sm:$0xff] }
  0xd5   : > { %977 = vst [vmem:[%s1759_s6 + $0x210] sm:$0xff] %v721_v2  ;;  %978 = vst [vmem:[%s1759_s6 + $0x218] sm:$0xff] %v722_v3  ;;  %v726_v7 = vld [vmem:[%s1749_s29 + $0x38] sm:$0xff]  ;;  %v727_v8 = vld [vmem:[%s1749_s29 + $0x40] sm:$0xff] }
  0xd6   : > { %979 = vst [vmem:[%s1759_s6 + $0x220] sm:$0xff] %v723_v4  ;;  %980 = vst [vmem:[%s1759_s6 + $0x228] sm:$0xff] %v724_v5  ;;  %v728_v9 = vld [vmem:[%s1749_s29 + $0x48] sm:$0xff]  ;;  %v729_v10 = vld [vmem:[%s1749_s29 + $0x50] sm:$0xff] }
  0xd7   : > { %981 = vst [vmem:[%s1759_s6 + $0x230] sm:$0xff] %v725_v6  ;;  %982 = vst [vmem:[%s1759_s6 + $0x238] sm:$0xff] %v726_v7  ;;  %v730_v11 = vld [vmem:[%s1749_s29 + $0x58] sm:$0xff]  ;;  %v731_v12 = vld [vmem:[%s1749_s29 + $0x60] sm:$0xff] }
  0xd8   : > { %983 = vst [vmem:[%s1759_s6 + $0x240] sm:$0xff] %v727_v8  ;;  %984 = vst [vmem:[%s1759_s6 + $0x248] sm:$0xff] %v728_v9  ;;  %v732_v13 = vld [vmem:[%s1749_s29 + $0x68] sm:$0xff]  ;;  %v733_v14 = vld [vmem:[%s1749_s29 + $0x70] sm:$0xff] }
  0xd9   : > { %985 = vst [vmem:[%s1759_s6 + $0x250] sm:$0xff] %v729_v10  ;;  %986 = vst [vmem:[%s1759_s6 + $0x258] sm:$0xff] %v730_v11  ;;  %v734_v15 = vld [vmem:[%s1749_s29 + $0x78] sm:$0xff]  ;;  %v735_v16 = vld [vmem:[%s1749_s29 + $0x80] sm:$0xff] }
  0xda   : > { %987 = vst [vmem:[%s1759_s6 + $0x260] sm:$0xff] %v731_v12  ;;  %988 = vst [vmem:[%s1759_s6 + $0x268] sm:$0xff] %v732_v13  ;;  %v736_v17 = vld [vmem:[%s1749_s29 + $0x88] sm:$0xff]  ;;  %v737_v18 = vld [vmem:[%s1749_s29 + $0x90] sm:$0xff] }
  0xdb   : > { %989 = vst [vmem:[%s1759_s6 + $0x270] sm:$0xff] %v733_v14  ;;  %990 = vst [vmem:[%s1759_s6 + $0x278] sm:$0xff] %v734_v15  ;;  %v738_v19 = vld [vmem:[%s1749_s29 + $0x98] sm:$0xff]  ;;  %v739_v20 = vld [vmem:[%s1749_s29 + $0xa0] sm:$0xff] }
  0xdc   : > { %991 = vst [vmem:[%s1759_s6 + $0x280] sm:$0xff] %v735_v16  ;;  %992 = vst [vmem:[%s1759_s6 + $0x288] sm:$0xff] %v736_v17  ;;  %v740_v21 = vld [vmem:[%s1749_s29 + $0xa8] sm:$0xff]  ;;  %v741_v22 = vld [vmem:[%s1749_s29 + $0xb0] sm:$0xff] }
  0xdd   : > { %993 = vst [vmem:[%s1759_s6 + $0x290] sm:$0xff] %v737_v18  ;;  %994 = vst [vmem:[%s1759_s6 + $0x298] sm:$0xff] %v738_v19  ;;  %v742_v23 = vld [vmem:[%s1749_s29 + $0xb8] sm:$0xff]  ;;  %v743_v24 = vld [vmem:[%s1749_s29 + $0xc0] sm:$0xff] }
  0xde   : > { %995 = vst [vmem:[%s1759_s6 + $0x2a0] sm:$0xff] %v739_v20  ;;  %996 = vst [vmem:[%s1759_s6 + $0x2a8] sm:$0xff] %v740_v21  ;;  %v744_v25 = vld [vmem:[%s1749_s29 + $0xc8] sm:$0xff]  ;;  %v745_v26 = vld [vmem:[%s1749_s29 + $0xd0] sm:$0xff] }
  0xdf   : > { %997 = vst [vmem:[%s1759_s6 + $0x2b0] sm:$0xff] %v741_v22  ;;  %998 = vst [vmem:[%s1759_s6 + $0x2b8] sm:$0xff] %v742_v23  ;;  %v746_v27 = vld [vmem:[%s1749_s29 + $0xd8] sm:$0xff]  ;;  %v747_v28 = vld [vmem:[%s1749_s29 + $0xe0] sm:$0xff] }
  0xe0   : > { %999 = vst [vmem:[%s1759_s6 + $0x2c0] sm:$0xff] %v743_v24  ;;  %1000 = vst [vmem:[%s1759_s6 + $0x2c8] sm:$0xff] %v744_v25  ;;  %v748_v29 = vld [vmem:[%s1749_s29 + $0xe8] sm:$0xff]  ;;  %v749_v30 = vld [vmem:[%s1749_s29 + $0xf0] sm:$0xff] }
  0xe1   : > { %1001 = vst [vmem:[%s1759_s6 + $0x2d0] sm:$0xff] %v745_v26  ;;  %1002 = vst [vmem:[%s1759_s6 + $0x2d8] sm:$0xff] %v746_v27  ;;  %v750_v31 = vld [vmem:[%s1749_s29 + $0xf8] sm:$0xff]  ;;  %v751_v32 = vld [vmem:[%s1749_s29 + $0x100] sm:$0xff] }
  0xe2   : > { %1003 = vst [vmem:[%s1759_s6 + $0x2e0] sm:$0xff] %v747_v28  ;;  %1004 = vst [vmem:[%s1759_s6 + $0x2e8] sm:$0xff] %v748_v29  ;;  %v752_v33 = vld [vmem:[%s1749_s29 + $0x108] sm:$0xff]  ;;  %v753_v34 = vld [vmem:[%s1749_s29 + $0x110] sm:$0xff] }
  0xe3   : > { %1005 = vst [vmem:[%s1759_s6 + $0x2f0] sm:$0xff] %v749_v30  ;;  %1006 = vst [vmem:[%s1759_s6 + $0x2f8] sm:$0xff] %v750_v31  ;;  %v754_v35 = vld [vmem:[%s1749_s29 + $0x118] sm:$0xff]  ;;  %v755_v36 = vld [vmem:[%s1749_s29 + $0x120] sm:$0xff] }
  0xe4   : > { %1007 = vst [vmem:[%s1759_s6 + $0x300] sm:$0xff] %v751_v32  ;;  %1008 = vst [vmem:[%s1759_s6 + $0x308] sm:$0xff] %v752_v33  ;;  %v756_v37 = vld [vmem:[%s1749_s29 + $0x128] sm:$0xff]  ;;  %v757_v38 = vld [vmem:[%s1749_s29 + $0x130] sm:$0xff] }
  0xe5   : > { %1009 = vst [vmem:[%s1759_s6 + $0x310] sm:$0xff] %v753_v34  ;;  %1010 = vst [vmem:[%s1759_s6 + $0x318] sm:$0xff] %v754_v35  ;;  %v758_v39 = vld [vmem:[%s1749_s29 + $0x138] sm:$0xff]  ;;  %v759_v40 = vld [vmem:[%s1749_s29 + $0x140] sm:$0xff] }
  0xe6   : > { %1011 = vst [vmem:[%s1759_s6 + $0x320] sm:$0xff] %v755_v36  ;;  %1012 = vst [vmem:[%s1759_s6 + $0x328] sm:$0xff] %v756_v37  ;;  %v760_v41 = vld [vmem:[%s1749_s29 + $0x148] sm:$0xff]  ;;  %v761_v42 = vld [vmem:[%s1749_s29 + $0x150] sm:$0xff] }
  0xe7   : > { %1013 = vst [vmem:[%s1759_s6 + $0x330] sm:$0xff] %v757_v38  ;;  %1014 = vst [vmem:[%s1759_s6 + $0x338] sm:$0xff] %v758_v39  ;;  %v762_v43 = vld [vmem:[%s1749_s29 + $0x158] sm:$0xff]  ;;  %v763_v44 = vld [vmem:[%s1749_s29 + $0x160] sm:$0xff] }
  0xe8   : > { %1015 = vst [vmem:[%s1759_s6 + $0x340] sm:$0xff] %v759_v40  ;;  %1016 = vst [vmem:[%s1759_s6 + $0x348] sm:$0xff] %v760_v41  ;;  %v764_v45 = vld [vmem:[%s1749_s29 + $0x168] sm:$0xff]  ;;  %v765_v46 = vld [vmem:[%s1749_s29 + $0x170] sm:$0xff] }
  0xe9   : > { %1017 = vst [vmem:[%s1759_s6 + $0x350] sm:$0xff] %v761_v42  ;;  %1018 = vst [vmem:[%s1759_s6 + $0x358] sm:$0xff] %v762_v43  ;;  %v766_v47 = vld [vmem:[%s1749_s29 + $0x178] sm:$0xff]  ;;  %v767_v48 = vld [vmem:[%s1749_s29 + $0x180] sm:$0xff] }
  0xea   : > { %1019 = vst [vmem:[%s1759_s6 + $0x360] sm:$0xff] %v763_v44  ;;  %1020 = vst [vmem:[%s1759_s6 + $0x368] sm:$0xff] %v764_v45  ;;  %v768_v49 = vld [vmem:[%s1749_s29 + $0x188] sm:$0xff]  ;;  %v769_v50 = vld [vmem:[%s1749_s29 + $0x190] sm:$0xff] }
  0xeb   : > { %1021 = vst [vmem:[%s1759_s6 + $0x370] sm:$0xff] %v765_v46  ;;  %1022 = vst [vmem:[%s1759_s6 + $0x378] sm:$0xff] %v766_v47  ;;  %v770_v51 = vld [vmem:[%s1749_s29 + $0x198] sm:$0xff]  ;;  %v771_v52 = vld [vmem:[%s1749_s29 + $0x1a0] sm:$0xff] }
  0xec   : > { %1023 = vst [vmem:[%s1759_s6 + $0x380] sm:$0xff] %v767_v48  ;;  %1024 = vst [vmem:[%s1759_s6 + $0x388] sm:$0xff] %v768_v49  ;;  %v772_v53 = vld [vmem:[%s1749_s29 + $0x1a8] sm:$0xff]  ;;  %v773_v54 = vld [vmem:[%s1749_s29 + $0x1b0] sm:$0xff] }
  0xed   : > { %1025 = vst [vmem:[%s1759_s6 + $0x390] sm:$0xff] %v769_v50  ;;  %1026 = vst [vmem:[%s1759_s6 + $0x398] sm:$0xff] %v770_v51  ;;  %v774_v55 = vld [vmem:[%s1749_s29 + $0x1b8] sm:$0xff]  ;;  %v775_v56 = vld [vmem:[%s1749_s29 + $0x1c0] sm:$0xff] }
  0xee   : > { %1027 = vst [vmem:[%s1759_s6 + $0x3a0] sm:$0xff] %v771_v52  ;;  %1028 = vst [vmem:[%s1759_s6 + $0x3a8] sm:$0xff] %v772_v53  ;;  %v776_v57 = vld [vmem:[%s1749_s29 + $0x1c8] sm:$0xff]  ;;  %v777_v58 = vld [vmem:[%s1749_s29 + $0x1d0] sm:$0xff] }
  0xef   : > { %1029 = vst [vmem:[%s1759_s6 + $0x3b0] sm:$0xff] %v773_v54  ;;  %1030 = vst [vmem:[%s1759_s6 + $0x3b8] sm:$0xff] %v774_v55  ;;  %v778_v59 = vld [vmem:[%s1749_s29 + $0x1d8] sm:$0xff]  ;;  %v779_v60 = vld [vmem:[%s1749_s29 + $0x1e0] sm:$0xff] }
  0xf0   : > { %1031 = vst [vmem:[%s1759_s6 + $0x3c0] sm:$0xff] %v775_v56  ;;  %1032 = vst [vmem:[%s1759_s6 + $0x3c8] sm:$0xff] %v776_v57  ;;  %v780_v61 = vld [vmem:[%s1749_s29 + $0x1e8] sm:$0xff]  ;;  %v781_v62 = vld [vmem:[%s1749_s29 + $0x1f0] sm:$0xff] }
  0xf1   : > { %1033 = vst [vmem:[%s1759_s6 + $0x3d0] sm:$0xff] %v777_v58  ;;  %1034 = vst [vmem:[%s1759_s6 + $0x3d8] sm:$0xff] %v778_v59  ;;  %v782_v63 = vld [vmem:[%s1749_s29 + $0x1f8] sm:$0xff]  ;;  %v783_v0 = vld [vmem:[%s1749_s29 + $0x200] sm:$0xff] }
  0xf2   : > { %1035 = vst [vmem:[%s1759_s6 + $0x3e0] sm:$0xff] %v779_v60  ;;  %1036 = vst [vmem:[%s1759_s6 + $0x3e8] sm:$0xff] %v780_v61  ;;  %v784_v1 = vld [vmem:[%s1749_s29 + $0x208] sm:$0xff]  ;;  %v785_v2 = vld [vmem:[%s1749_s29 + $0x210] sm:$0xff] }
  0xf3   : > { %1037 = vst [vmem:[%s1759_s6 + $0x3f0] sm:$0xff] %v781_v62  ;;  %1038 = vst [vmem:[%s1759_s6 + $0x3f8] sm:$0xff] %v782_v63  ;;  %v786_v3 = vld [vmem:[%s1749_s29 + $0x218] sm:$0xff]  ;;  %v787_v4 = vld [vmem:[%s1749_s29 + $0x220] sm:$0xff] }
  0xf4   : > { %1039 = vst [vmem:[%s1759_s6 + $0x600] sm:$0xff] %v783_v0  ;;  %1040 = vst [vmem:[%s1759_s6 + $0x608] sm:$0xff] %v784_v1  ;;  %v788_v5 = vld [vmem:[%s1749_s29 + $0x228] sm:$0xff]  ;;  %v789_v6 = vld [vmem:[%s1749_s29 + $0x230] sm:$0xff] }
  0xf5   : > { %1041 = vst [vmem:[%s1759_s6 + $0x610] sm:$0xff] %v785_v2  ;;  %1042 = vst [vmem:[%s1759_s6 + $0x618] sm:$0xff] %v786_v3  ;;  %v790_v7 = vld [vmem:[%s1749_s29 + $0x238] sm:$0xff]  ;;  %v791_v8 = vld [vmem:[%s1749_s29 + $0x240] sm:$0xff] }
  0xf6   : > { %1043 = vst [vmem:[%s1759_s6 + $0x620] sm:$0xff] %v787_v4  ;;  %1044 = vst [vmem:[%s1759_s6 + $0x628] sm:$0xff] %v788_v5  ;;  %v792_v9 = vld [vmem:[%s1749_s29 + $0x248] sm:$0xff]  ;;  %v793_v10 = vld [vmem:[%s1749_s29 + $0x250] sm:$0xff] }
  0xf7   : > { %1045 = vst [vmem:[%s1759_s6 + $0x630] sm:$0xff] %v789_v6  ;;  %1046 = vst [vmem:[%s1759_s6 + $0x638] sm:$0xff] %v790_v7  ;;  %v794_v11 = vld [vmem:[%s1749_s29 + $0x258] sm:$0xff]  ;;  %v795_v12 = vld [vmem:[%s1749_s29 + $0x260] sm:$0xff] }
  0xf8   : > { %1047 = vst [vmem:[%s1759_s6 + $0x640] sm:$0xff] %v791_v8  ;;  %1048 = vst [vmem:[%s1759_s6 + $0x648] sm:$0xff] %v792_v9  ;;  %v796_v13 = vld [vmem:[%s1749_s29 + $0x268] sm:$0xff]  ;;  %v797_v14 = vld [vmem:[%s1749_s29 + $0x270] sm:$0xff] }
  0xf9   : > { %1049 = vst [vmem:[%s1759_s6 + $0x650] sm:$0xff] %v793_v10  ;;  %1050 = vst [vmem:[%s1759_s6 + $0x658] sm:$0xff] %v794_v11  ;;  %v798_v15 = vld [vmem:[%s1749_s29 + $0x278] sm:$0xff]  ;;  %v799_v16 = vld [vmem:[%s1749_s29 + $0x280] sm:$0xff] }
  0xfa   : > { %1051 = vst [vmem:[%s1759_s6 + $0x660] sm:$0xff] %v795_v12  ;;  %1052 = vst [vmem:[%s1759_s6 + $0x668] sm:$0xff] %v796_v13  ;;  %v800_v17 = vld [vmem:[%s1749_s29 + $0x288] sm:$0xff]  ;;  %v801_v18 = vld [vmem:[%s1749_s29 + $0x290] sm:$0xff] }
  0xfb   : > { %1053 = vst [vmem:[%s1759_s6 + $0x670] sm:$0xff] %v797_v14  ;;  %1054 = vst [vmem:[%s1759_s6 + $0x678] sm:$0xff] %v798_v15  ;;  %v802_v19 = vld [vmem:[%s1749_s29 + $0x298] sm:$0xff]  ;;  %v803_v20 = vld [vmem:[%s1749_s29 + $0x2a0] sm:$0xff] }
  0xfc   : > { %1055 = vst [vmem:[%s1759_s6 + $0x680] sm:$0xff] %v799_v16  ;;  %1056 = vst [vmem:[%s1759_s6 + $0x688] sm:$0xff] %v800_v17  ;;  %v804_v21 = vld [vmem:[%s1749_s29 + $0x2a8] sm:$0xff]  ;;  %v805_v22 = vld [vmem:[%s1749_s29 + $0x2b0] sm:$0xff] }
  0xfd   : > { %1057 = vst [vmem:[%s1759_s6 + $0x690] sm:$0xff] %v801_v18  ;;  %1058 = vst [vmem:[%s1759_s6 + $0x698] sm:$0xff] %v802_v19  ;;  %v806_v23 = vld [vmem:[%s1749_s29 + $0x2b8] sm:$0xff]  ;;  %v807_v24 = vld [vmem:[%s1749_s29 + $0x2c0] sm:$0xff] }
  0xfe   : > { %1059 = vst [vmem:[%s1759_s6 + $0x6a0] sm:$0xff] %v803_v20  ;;  %1060 = vst [vmem:[%s1759_s6 + $0x6a8] sm:$0xff] %v804_v21  ;;  %v808_v25 = vld [vmem:[%s1749_s29 + $0x2c8] sm:$0xff]  ;;  %v809_v26 = vld [vmem:[%s1749_s29 + $0x2d0] sm:$0xff] }
  0xff   : > { %1061 = vst [vmem:[%s1759_s6 + $0x6b0] sm:$0xff] %v805_v22  ;;  %1062 = vst [vmem:[%s1759_s6 + $0x6b8] sm:$0xff] %v806_v23  ;;  %v810_v27 = vld [vmem:[%s1749_s29 + $0x2d8] sm:$0xff]  ;;  %v811_v28 = vld [vmem:[%s1749_s29 + $0x2e0] sm:$0xff] }
 0x100   : > { %1063 = vst [vmem:[%s1759_s6 + $0x6c0] sm:$0xff] %v807_v24  ;;  %1064 = vst [vmem:[%s1759_s6 + $0x6c8] sm:$0xff] %v808_v25  ;;  %v812_v29 = vld [vmem:[%s1749_s29 + $0x2e8] sm:$0xff]  ;;  %v813_v30 = vld [vmem:[%s1749_s29 + $0x2f0] sm:$0xff] }
 0x101   : > { %1065 = vst [vmem:[%s1759_s6 + $0x6d0] sm:$0xff] %v809_v26  ;;  %1066 = vst [vmem:[%s1759_s6 + $0x6d8] sm:$0xff] %v810_v27  ;;  %v814_v31 = vld [vmem:[%s1749_s29 + $0x2f8] sm:$0xff]  ;;  %v815_v32 = vld [vmem:[%s1749_s29 + $0x300] sm:$0xff] }
 0x102   : > { %1067 = vst [vmem:[%s1759_s6 + $0x6e0] sm:$0xff] %v811_v28  ;;  %1068 = vst [vmem:[%s1759_s6 + $0x6e8] sm:$0xff] %v812_v29  ;;  %v816_v33 = vld [vmem:[%s1749_s29 + $0x308] sm:$0xff]  ;;  %v817_v34 = vld [vmem:[%s1749_s29 + $0x310] sm:$0xff] }
 0x103   : > { %1069 = vst [vmem:[%s1759_s6 + $0x6f0] sm:$0xff] %v813_v30  ;;  %1070 = vst [vmem:[%s1759_s6 + $0x6f8] sm:$0xff] %v814_v31  ;;  %v818_v35 = vld [vmem:[%s1749_s29 + $0x318] sm:$0xff]  ;;  %v819_v36 = vld [vmem:[%s1749_s29 + $0x320] sm:$0xff] }
 0x104   : > { %1071 = vst [vmem:[%s1759_s6 + $0x700] sm:$0xff] %v815_v32  ;;  %1072 = vst [vmem:[%s1759_s6 + $0x708] sm:$0xff] %v816_v33  ;;  %v820_v37 = vld [vmem:[%s1749_s29 + $0x328] sm:$0xff]  ;;  %v821_v38 = vld [vmem:[%s1749_s29 + $0x330] sm:$0xff] }
 0x105   : > { %1073 = vst [vmem:[%s1759_s6 + $0x710] sm:$0xff] %v817_v34  ;;  %1074 = vst [vmem:[%s1759_s6 + $0x718] sm:$0xff] %v818_v35  ;;  %v822_v39 = vld [vmem:[%s1749_s29 + $0x338] sm:$0xff]  ;;  %v823_v40 = vld [vmem:[%s1749_s29 + $0x340] sm:$0xff] }
 0x106   : > { %1075 = vst [vmem:[%s1759_s6 + $0x720] sm:$0xff] %v819_v36  ;;  %1076 = vst [vmem:[%s1759_s6 + $0x728] sm:$0xff] %v820_v37  ;;  %v824_v41 = vld [vmem:[%s1749_s29 + $0x348] sm:$0xff]  ;;  %v825_v42 = vld [vmem:[%s1749_s29 + $0x350] sm:$0xff] }
 0x107   : > { %1077 = vst [vmem:[%s1759_s6 + $0x730] sm:$0xff] %v821_v38  ;;  %1078 = vst [vmem:[%s1759_s6 + $0x738] sm:$0xff] %v822_v39  ;;  %v826_v43 = vld [vmem:[%s1749_s29 + $0x358] sm:$0xff]  ;;  %v827_v44 = vld [vmem:[%s1749_s29 + $0x360] sm:$0xff] }
 0x108   : > { %1079 = vst [vmem:[%s1759_s6 + $0x740] sm:$0xff] %v823_v40  ;;  %1080 = vst [vmem:[%s1759_s6 + $0x748] sm:$0xff] %v824_v41  ;;  %v828_v45 = vld [vmem:[%s1749_s29 + $0x368] sm:$0xff]  ;;  %v829_v46 = vld [vmem:[%s1749_s29 + $0x370] sm:$0xff] }
 0x109   : > { %1081 = vst [vmem:[%s1759_s6 + $0x750] sm:$0xff] %v825_v42  ;;  %1082 = vst [vmem:[%s1759_s6 + $0x758] sm:$0xff] %v826_v43  ;;  %v830_v47 = vld [vmem:[%s1749_s29 + $0x378] sm:$0xff]  ;;  %v831_v48 = vld [vmem:[%s1749_s29 + $0x380] sm:$0xff] }
 0x10a   : > { %1083 = vst [vmem:[%s1759_s6 + $0x760] sm:$0xff] %v827_v44  ;;  %1084 = vst [vmem:[%s1759_s6 + $0x768] sm:$0xff] %v828_v45  ;;  %v832_v49 = vld [vmem:[%s1749_s29 + $0x388] sm:$0xff]  ;;  %v833_v50 = vld [vmem:[%s1749_s29 + $0x390] sm:$0xff] }
 0x10b   : > { %1085 = vst [vmem:[%s1759_s6 + $0x770] sm:$0xff] %v829_v46  ;;  %1086 = vst [vmem:[%s1759_s6 + $0x778] sm:$0xff] %v830_v47  ;;  %v834_v51 = vld [vmem:[%s1749_s29 + $0x398] sm:$0xff]  ;;  %v835_v52 = vld [vmem:[%s1749_s29 + $0x3a0] sm:$0xff] }
 0x10c   : > { %1087 = vst [vmem:[%s1759_s6 + $0x780] sm:$0xff] %v831_v48  ;;  %1088 = vst [vmem:[%s1759_s6 + $0x788] sm:$0xff] %v832_v49  ;;  %v836_v53 = vld [vmem:[%s1749_s29 + $0x3a8] sm:$0xff]  ;;  %v837_v54 = vld [vmem:[%s1749_s29 + $0x3b0] sm:$0xff] }
 0x10d   : > { %1089 = vst [vmem:[%s1759_s6 + $0x790] sm:$0xff] %v833_v50  ;;  %1090 = vst [vmem:[%s1759_s6 + $0x798] sm:$0xff] %v834_v51  ;;  %v838_v55 = vld [vmem:[%s1749_s29 + $0x3b8] sm:$0xff]  ;;  %v839_v56 = vld [vmem:[%s1749_s29 + $0x3c0] sm:$0xff] }
 0x10e   : > { %1091 = vst [vmem:[%s1759_s6 + $0x7a0] sm:$0xff] %v835_v52  ;;  %1092 = vst [vmem:[%s1759_s6 + $0x7a8] sm:$0xff] %v836_v53  ;;  %v840_v57 = vld [vmem:[%s1749_s29 + $0x3c8] sm:$0xff]  ;;  %v841_v58 = vld [vmem:[%s1749_s29 + $0x3d0] sm:$0xff] }
 0x10f   : > { %1093 = vst [vmem:[%s1759_s6 + $0x7b0] sm:$0xff] %v837_v54  ;;  %1094 = vst [vmem:[%s1759_s6 + $0x7b8] sm:$0xff] %v838_v55  ;;  %v842_v59 = vld [vmem:[%s1749_s29 + $0x3d8] sm:$0xff]  ;;  %v843_v60 = vld [vmem:[%s1749_s29 + $0x3e0] sm:$0xff] }
 0x110   : > { %1095 = vst [vmem:[%s1759_s6 + $0x7c0] sm:$0xff] %v839_v56  ;;  %1096 = vst [vmem:[%s1759_s6 + $0x7c8] sm:$0xff] %v840_v57  ;;  %v844_v61 = vld [vmem:[%s1749_s29 + $0x3e8] sm:$0xff]  ;;  %v845_v62 = vld [vmem:[%s1749_s29 + $0x3f0] sm:$0xff] }
 0x111   : > { %1097 = vst [vmem:[%s1759_s6 + $0x7d0] sm:$0xff] %v841_v58  ;;  %1098 = vst [vmem:[%s1759_s6 + $0x7d8] sm:$0xff] %v842_v59  ;;  %v846_v63 = vld [vmem:[%s1749_s29 + $0x3f8] sm:$0xff]  ;;  %v847_v0 = vld [vmem:[%s1749_s29 + $0x400] sm:$0xff] }
 0x112   : > { %1099 = vst [vmem:[%s1759_s6 + $0x7e0] sm:$0xff] %v843_v60  ;;  %1100 = vst [vmem:[%s1759_s6 + $0x7e8] sm:$0xff] %v844_v61  ;;  %v848_v1 = vld [vmem:[%s1749_s29 + $0x408] sm:$0xff]  ;;  %v849_v2 = vld [vmem:[%s1749_s29 + $0x410] sm:$0xff] }
 0x113   : > { %1101 = vst [vmem:[%s1759_s6 + $0x7f0] sm:$0xff] %v845_v62  ;;  %1102 = vst [vmem:[%s1759_s6 + $0x7f8] sm:$0xff] %v846_v63  ;;  %v850_v3 = vld [vmem:[%s1749_s29 + $0x418] sm:$0xff]  ;;  %v851_v4 = vld [vmem:[%s1749_s29 + $0x420] sm:$0xff] }
 0x114   : > { %1103 = vst [vmem:[%s1759_s6 + $0xa00] sm:$0xff] %v847_v0  ;;  %1104 = vst [vmem:[%s1759_s6 + $0xa08] sm:$0xff] %v848_v1  ;;  %v852_v5 = vld [vmem:[%s1749_s29 + $0x428] sm:$0xff]  ;;  %v853_v6 = vld [vmem:[%s1749_s29 + $0x430] sm:$0xff] }
 0x115   : > { %1105 = vst [vmem:[%s1759_s6 + $0xa10] sm:$0xff] %v849_v2  ;;  %1106 = vst [vmem:[%s1759_s6 + $0xa18] sm:$0xff] %v850_v3  ;;  %v854_v7 = vld [vmem:[%s1749_s29 + $0x438] sm:$0xff]  ;;  %v855_v8 = vld [vmem:[%s1749_s29 + $0x440] sm:$0xff] }
 0x116   : > { %1107 = vst [vmem:[%s1759_s6 + $0xa20] sm:$0xff] %v851_v4  ;;  %1108 = vst [vmem:[%s1759_s6 + $0xa28] sm:$0xff] %v852_v5  ;;  %v856_v9 = vld [vmem:[%s1749_s29 + $0x448] sm:$0xff]  ;;  %v857_v10 = vld [vmem:[%s1749_s29 + $0x450] sm:$0xff] }
 0x117   : > { %1109 = vst [vmem:[%s1759_s6 + $0xa30] sm:$0xff] %v853_v6  ;;  %1110 = vst [vmem:[%s1759_s6 + $0xa38] sm:$0xff] %v854_v7  ;;  %v858_v11 = vld [vmem:[%s1749_s29 + $0x458] sm:$0xff]  ;;  %v859_v12 = vld [vmem:[%s1749_s29 + $0x460] sm:$0xff] }
 0x118   : > { %1111 = vst [vmem:[%s1759_s6 + $0xa40] sm:$0xff] %v855_v8  ;;  %1112 = vst [vmem:[%s1759_s6 + $0xa48] sm:$0xff] %v856_v9  ;;  %v860_v13 = vld [vmem:[%s1749_s29 + $0x468] sm:$0xff]  ;;  %v861_v14 = vld [vmem:[%s1749_s29 + $0x470] sm:$0xff] }
 0x119   : > { %1113 = vst [vmem:[%s1759_s6 + $0xa50] sm:$0xff] %v857_v10  ;;  %1114 = vst [vmem:[%s1759_s6 + $0xa58] sm:$0xff] %v858_v11  ;;  %v862_v15 = vld [vmem:[%s1749_s29 + $0x478] sm:$0xff]  ;;  %v863_v16 = vld [vmem:[%s1749_s29 + $0x480] sm:$0xff] }
 0x11a   : > { %1115 = vst [vmem:[%s1759_s6 + $0xa60] sm:$0xff] %v859_v12  ;;  %1116 = vst [vmem:[%s1759_s6 + $0xa68] sm:$0xff] %v860_v13  ;;  %v864_v17 = vld [vmem:[%s1749_s29 + $0x488] sm:$0xff]  ;;  %v865_v18 = vld [vmem:[%s1749_s29 + $0x490] sm:$0xff] }
 0x11b   : > { %1117 = vst [vmem:[%s1759_s6 + $0xa70] sm:$0xff] %v861_v14  ;;  %1118 = vst [vmem:[%s1759_s6 + $0xa78] sm:$0xff] %v862_v15  ;;  %v866_v19 = vld [vmem:[%s1749_s29 + $0x498] sm:$0xff]  ;;  %v867_v20 = vld [vmem:[%s1749_s29 + $0x4a0] sm:$0xff] }
 0x11c   : > { %1119 = vst [vmem:[%s1759_s6 + $0xa80] sm:$0xff] %v863_v16  ;;  %1120 = vst [vmem:[%s1759_s6 + $0xa88] sm:$0xff] %v864_v17  ;;  %v868_v21 = vld [vmem:[%s1749_s29 + $0x4a8] sm:$0xff]  ;;  %v869_v22 = vld [vmem:[%s1749_s29 + $0x4b0] sm:$0xff] }
 0x11d   : > { %1121 = vst [vmem:[%s1759_s6 + $0xa90] sm:$0xff] %v865_v18  ;;  %1122 = vst [vmem:[%s1759_s6 + $0xa98] sm:$0xff] %v866_v19  ;;  %v870_v23 = vld [vmem:[%s1749_s29 + $0x4b8] sm:$0xff]  ;;  %v871_v24 = vld [vmem:[%s1749_s29 + $0x4c0] sm:$0xff] }
 0x11e   : > { %1123 = vst [vmem:[%s1759_s6 + $0xaa0] sm:$0xff] %v867_v20  ;;  %1124 = vst [vmem:[%s1759_s6 + $0xaa8] sm:$0xff] %v868_v21  ;;  %v872_v25 = vld [vmem:[%s1749_s29 + $0x4c8] sm:$0xff]  ;;  %v873_v26 = vld [vmem:[%s1749_s29 + $0x4d0] sm:$0xff] }
 0x11f   : > { %1125 = vst [vmem:[%s1759_s6 + $0xab0] sm:$0xff] %v869_v22  ;;  %1126 = vst [vmem:[%s1759_s6 + $0xab8] sm:$0xff] %v870_v23  ;;  %v874_v27 = vld [vmem:[%s1749_s29 + $0x4d8] sm:$0xff]  ;;  %v875_v28 = vld [vmem:[%s1749_s29 + $0x4e0] sm:$0xff] }
 0x120   : > { %1127 = vst [vmem:[%s1759_s6 + $0xac0] sm:$0xff] %v871_v24  ;;  %1128 = vst [vmem:[%s1759_s6 + $0xac8] sm:$0xff] %v872_v25  ;;  %v876_v29 = vld [vmem:[%s1749_s29 + $0x4e8] sm:$0xff]  ;;  %v877_v30 = vld [vmem:[%s1749_s29 + $0x4f0] sm:$0xff] }
 0x121   : > { %1129 = vst [vmem:[%s1759_s6 + $0xad0] sm:$0xff] %v873_v26  ;;  %1130 = vst [vmem:[%s1759_s6 + $0xad8] sm:$0xff] %v874_v27  ;;  %v878_v31 = vld [vmem:[%s1749_s29 + $0x4f8] sm:$0xff]  ;;  %v879_v32 = vld [vmem:[%s1749_s29 + $0x500] sm:$0xff] }
 0x122   : > { %1131 = vst [vmem:[%s1759_s6 + $0xae0] sm:$0xff] %v875_v28  ;;  %1132 = vst [vmem:[%s1759_s6 + $0xae8] sm:$0xff] %v876_v29  ;;  %v880_v33 = vld [vmem:[%s1749_s29 + $0x508] sm:$0xff]  ;;  %v881_v34 = vld [vmem:[%s1749_s29 + $0x510] sm:$0xff] }
 0x123   : > { %1133 = vst [vmem:[%s1759_s6 + $0xaf0] sm:$0xff] %v877_v30  ;;  %1134 = vst [vmem:[%s1759_s6 + $0xaf8] sm:$0xff] %v878_v31  ;;  %v882_v35 = vld [vmem:[%s1749_s29 + $0x518] sm:$0xff]  ;;  %v883_v36 = vld [vmem:[%s1749_s29 + $0x520] sm:$0xff] }
 0x124   : > { %1135 = vst [vmem:[%s1759_s6 + $0xb00] sm:$0xff] %v879_v32  ;;  %1136 = vst [vmem:[%s1759_s6 + $0xb08] sm:$0xff] %v880_v33  ;;  %v884_v37 = vld [vmem:[%s1749_s29 + $0x528] sm:$0xff]  ;;  %v885_v38 = vld [vmem:[%s1749_s29 + $0x530] sm:$0xff] }
 0x125   : > { %1137 = vst [vmem:[%s1759_s6 + $0xb10] sm:$0xff] %v881_v34  ;;  %1138 = vst [vmem:[%s1759_s6 + $0xb18] sm:$0xff] %v882_v35  ;;  %v886_v39 = vld [vmem:[%s1749_s29 + $0x538] sm:$0xff]  ;;  %v887_v40 = vld [vmem:[%s1749_s29 + $0x540] sm:$0xff] }
 0x126   : > { %1139 = vst [vmem:[%s1759_s6 + $0xb20] sm:$0xff] %v883_v36  ;;  %1140 = vst [vmem:[%s1759_s6 + $0xb28] sm:$0xff] %v884_v37  ;;  %v888_v41 = vld [vmem:[%s1749_s29 + $0x548] sm:$0xff]  ;;  %v889_v42 = vld [vmem:[%s1749_s29 + $0x550] sm:$0xff] }
 0x127   : > { %1141 = vst [vmem:[%s1759_s6 + $0xb30] sm:$0xff] %v885_v38  ;;  %1142 = vst [vmem:[%s1759_s6 + $0xb38] sm:$0xff] %v886_v39  ;;  %v890_v43 = vld [vmem:[%s1749_s29 + $0x558] sm:$0xff]  ;;  %v891_v44 = vld [vmem:[%s1749_s29 + $0x560] sm:$0xff] }
 0x128   : > { %1143 = vst [vmem:[%s1759_s6 + $0xb40] sm:$0xff] %v887_v40  ;;  %1144 = vst [vmem:[%s1759_s6 + $0xb48] sm:$0xff] %v888_v41  ;;  %v892_v45 = vld [vmem:[%s1749_s29 + $0x568] sm:$0xff]  ;;  %v893_v46 = vld [vmem:[%s1749_s29 + $0x570] sm:$0xff] }
 0x129   : > { %1145 = vst [vmem:[%s1759_s6 + $0xb50] sm:$0xff] %v889_v42  ;;  %1146 = vst [vmem:[%s1759_s6 + $0xb58] sm:$0xff] %v890_v43  ;;  %v894_v47 = vld [vmem:[%s1749_s29 + $0x578] sm:$0xff]  ;;  %v895_v48 = vld [vmem:[%s1749_s29 + $0x580] sm:$0xff] }
 0x12a   : > { %1147 = vst [vmem:[%s1759_s6 + $0xb60] sm:$0xff] %v891_v44  ;;  %1148 = vst [vmem:[%s1759_s6 + $0xb68] sm:$0xff] %v892_v45  ;;  %v896_v49 = vld [vmem:[%s1749_s29 + $0x588] sm:$0xff]  ;;  %v897_v50 = vld [vmem:[%s1749_s29 + $0x590] sm:$0xff] }
 0x12b   : > { %1149 = vst [vmem:[%s1759_s6 + $0xb70] sm:$0xff] %v893_v46  ;;  %1150 = vst [vmem:[%s1759_s6 + $0xb78] sm:$0xff] %v894_v47  ;;  %v898_v51 = vld [vmem:[%s1749_s29 + $0x598] sm:$0xff]  ;;  %v899_v52 = vld [vmem:[%s1749_s29 + $0x5a0] sm:$0xff] }
 0x12c   : > { %1151 = vst [vmem:[%s1759_s6 + $0xb80] sm:$0xff] %v895_v48  ;;  %1152 = vst [vmem:[%s1759_s6 + $0xb88] sm:$0xff] %v896_v49  ;;  %v900_v53 = vld [vmem:[%s1749_s29 + $0x5a8] sm:$0xff]  ;;  %v901_v54 = vld [vmem:[%s1749_s29 + $0x5b0] sm:$0xff] }
 0x12d   : > { %1153 = vst [vmem:[%s1759_s6 + $0xb90] sm:$0xff] %v897_v50  ;;  %1154 = vst [vmem:[%s1759_s6 + $0xb98] sm:$0xff] %v898_v51  ;;  %v902_v55 = vld [vmem:[%s1749_s29 + $0x5b8] sm:$0xff]  ;;  %v903_v56 = vld [vmem:[%s1749_s29 + $0x5c0] sm:$0xff] }
 0x12e   : > { %1155 = vst [vmem:[%s1759_s6 + $0xba0] sm:$0xff] %v899_v52  ;;  %1156 = vst [vmem:[%s1759_s6 + $0xba8] sm:$0xff] %v900_v53  ;;  %v904_v57 = vld [vmem:[%s1749_s29 + $0x5c8] sm:$0xff]  ;;  %v905_v58 = vld [vmem:[%s1749_s29 + $0x5d0] sm:$0xff] }
 0x12f   : > { %1157 = vst [vmem:[%s1759_s6 + $0xbb0] sm:$0xff] %v901_v54  ;;  %1158 = vst [vmem:[%s1759_s6 + $0xbb8] sm:$0xff] %v902_v55  ;;  %v906_v59 = vld [vmem:[%s1749_s29 + $0x5d8] sm:$0xff]  ;;  %v907_v60 = vld [vmem:[%s1749_s29 + $0x5e0] sm:$0xff] }
 0x130   : > { %1159 = vst [vmem:[%s1759_s6 + $0xbc0] sm:$0xff] %v903_v56  ;;  %1160 = vst [vmem:[%s1759_s6 + $0xbc8] sm:$0xff] %v904_v57  ;;  %v908_v61 = vld [vmem:[%s1749_s29 + $0x5e8] sm:$0xff]  ;;  %v909_v62 = vld [vmem:[%s1749_s29 + $0x5f0] sm:$0xff] }
 0x131   : > { %1161 = vst [vmem:[%s1759_s6 + $0xbd0] sm:$0xff] %v905_v58  ;;  %1162 = vst [vmem:[%s1759_s6 + $0xbd8] sm:$0xff] %v906_v59  ;;  %v910_v63 = vld [vmem:[%s1749_s29 + $0x5f8] sm:$0xff]  ;;  %v911_v0 = vld [vmem:[%s1749_s29 + $0x600] sm:$0xff] }
 0x132   : > { %1163 = vst [vmem:[%s1759_s6 + $0xbe0] sm:$0xff] %v907_v60  ;;  %1164 = vst [vmem:[%s1759_s6 + $0xbe8] sm:$0xff] %v908_v61  ;;  %v912_v1 = vld [vmem:[%s1749_s29 + $0x608] sm:$0xff]  ;;  %v913_v2 = vld [vmem:[%s1749_s29 + $0x610] sm:$0xff] }
 0x133   : > { %1165 = vst [vmem:[%s1759_s6 + $0xbf0] sm:$0xff] %v909_v62  ;;  %1166 = vst [vmem:[%s1759_s6 + $0xbf8] sm:$0xff] %v910_v63  ;;  %v914_v3 = vld [vmem:[%s1749_s29 + $0x618] sm:$0xff]  ;;  %v915_v4 = vld [vmem:[%s1749_s29 + $0x620] sm:$0xff] }
 0x134   : > { %1167 = vst [vmem:[%s1759_s6 + $0xe00] sm:$0xff] %v911_v0  ;;  %1168 = vst [vmem:[%s1759_s6 + $0xe08] sm:$0xff] %v912_v1  ;;  %v916_v5 = vld [vmem:[%s1749_s29 + $0x628] sm:$0xff]  ;;  %v917_v6 = vld [vmem:[%s1749_s29 + $0x630] sm:$0xff] }
 0x135   : > { %1169 = vst [vmem:[%s1759_s6 + $0xe10] sm:$0xff] %v913_v2  ;;  %1170 = vst [vmem:[%s1759_s6 + $0xe18] sm:$0xff] %v914_v3  ;;  %v918_v7 = vld [vmem:[%s1749_s29 + $0x638] sm:$0xff]  ;;  %v919_v8 = vld [vmem:[%s1749_s29 + $0x640] sm:$0xff] }
 0x136   : > { %1171 = vst [vmem:[%s1759_s6 + $0xe20] sm:$0xff] %v915_v4  ;;  %1172 = vst [vmem:[%s1759_s6 + $0xe28] sm:$0xff] %v916_v5  ;;  %v920_v9 = vld [vmem:[%s1749_s29 + $0x648] sm:$0xff]  ;;  %v921_v10 = vld [vmem:[%s1749_s29 + $0x650] sm:$0xff] }
 0x137   : > { %1173 = vst [vmem:[%s1759_s6 + $0xe30] sm:$0xff] %v917_v6  ;;  %1174 = vst [vmem:[%s1759_s6 + $0xe38] sm:$0xff] %v918_v7  ;;  %v922_v11 = vld [vmem:[%s1749_s29 + $0x658] sm:$0xff]  ;;  %v923_v12 = vld [vmem:[%s1749_s29 + $0x660] sm:$0xff] }
 0x138   : > { %1175 = vst [vmem:[%s1759_s6 + $0xe40] sm:$0xff] %v919_v8  ;;  %1176 = vst [vmem:[%s1759_s6 + $0xe48] sm:$0xff] %v920_v9  ;;  %v924_v13 = vld [vmem:[%s1749_s29 + $0x668] sm:$0xff]  ;;  %v925_v14 = vld [vmem:[%s1749_s29 + $0x670] sm:$0xff] }
 0x139   : > { %1177 = vst [vmem:[%s1759_s6 + $0xe50] sm:$0xff] %v921_v10  ;;  %1178 = vst [vmem:[%s1759_s6 + $0xe58] sm:$0xff] %v922_v11  ;;  %v926_v15 = vld [vmem:[%s1749_s29 + $0x678] sm:$0xff]  ;;  %v927_v16 = vld [vmem:[%s1749_s29 + $0x680] sm:$0xff] }
 0x13a   : > { %1179 = vst [vmem:[%s1759_s6 + $0xe60] sm:$0xff] %v923_v12  ;;  %1180 = vst [vmem:[%s1759_s6 + $0xe68] sm:$0xff] %v924_v13  ;;  %v928_v17 = vld [vmem:[%s1749_s29 + $0x688] sm:$0xff]  ;;  %v929_v18 = vld [vmem:[%s1749_s29 + $0x690] sm:$0xff] }
 0x13b   : > { %1181 = vst [vmem:[%s1759_s6 + $0xe70] sm:$0xff] %v925_v14  ;;  %1182 = vst [vmem:[%s1759_s6 + $0xe78] sm:$0xff] %v926_v15  ;;  %v930_v19 = vld [vmem:[%s1749_s29 + $0x698] sm:$0xff]  ;;  %v931_v20 = vld [vmem:[%s1749_s29 + $0x6a0] sm:$0xff] }
 0x13c   : > { %1183 = vst [vmem:[%s1759_s6 + $0xe80] sm:$0xff] %v927_v16  ;;  %1184 = vst [vmem:[%s1759_s6 + $0xe88] sm:$0xff] %v928_v17  ;;  %v932_v21 = vld [vmem:[%s1749_s29 + $0x6a8] sm:$0xff]  ;;  %v933_v22 = vld [vmem:[%s1749_s29 + $0x6b0] sm:$0xff] }
 0x13d   : > { %1185 = vst [vmem:[%s1759_s6 + $0xe90] sm:$0xff] %v929_v18  ;;  %1186 = vst [vmem:[%s1759_s6 + $0xe98] sm:$0xff] %v930_v19  ;;  %v934_v23 = vld [vmem:[%s1749_s29 + $0x6b8] sm:$0xff]  ;;  %v935_v24 = vld [vmem:[%s1749_s29 + $0x6c0] sm:$0xff] }
 0x13e   : > { %1187 = vst [vmem:[%s1759_s6 + $0xea0] sm:$0xff] %v931_v20  ;;  %1188 = vst [vmem:[%s1759_s6 + $0xea8] sm:$0xff] %v932_v21  ;;  %v936_v25 = vld [vmem:[%s1749_s29 + $0x6c8] sm:$0xff]  ;;  %v937_v26 = vld [vmem:[%s1749_s29 + $0x6d0] sm:$0xff] }
 0x13f   : > { %1189 = vst [vmem:[%s1759_s6 + $0xeb0] sm:$0xff] %v933_v22  ;;  %1190 = vst [vmem:[%s1759_s6 + $0xeb8] sm:$0xff] %v934_v23  ;;  %v938_v27 = vld [vmem:[%s1749_s29 + $0x6d8] sm:$0xff]  ;;  %v939_v28 = vld [vmem:[%s1749_s29 + $0x6e0] sm:$0xff] }
 0x140   : > { %1191 = vst [vmem:[%s1759_s6 + $0xec0] sm:$0xff] %v935_v24  ;;  %1192 = vst [vmem:[%s1759_s6 + $0xec8] sm:$0xff] %v936_v25  ;;  %v940_v29 = vld [vmem:[%s1749_s29 + $0x6e8] sm:$0xff]  ;;  %v941_v30 = vld [vmem:[%s1749_s29 + $0x6f0] sm:$0xff] }
 0x141   : > { %1193 = vst [vmem:[%s1759_s6 + $0xed0] sm:$0xff] %v937_v26  ;;  %1194 = vst [vmem:[%s1759_s6 + $0xed8] sm:$0xff] %v938_v27  ;;  %v942_v31 = vld [vmem:[%s1749_s29 + $0x6f8] sm:$0xff]  ;;  %v943_v32 = vld [vmem:[%s1749_s29 + $0x700] sm:$0xff] }
 0x142   : > { %1195 = vst [vmem:[%s1759_s6 + $0xee0] sm:$0xff] %v939_v28  ;;  %1196 = vst [vmem:[%s1759_s6 + $0xee8] sm:$0xff] %v940_v29  ;;  %v944_v33 = vld [vmem:[%s1749_s29 + $0x708] sm:$0xff]  ;;  %v945_v34 = vld [vmem:[%s1749_s29 + $0x710] sm:$0xff] }
 0x143   : > { %1197 = vst [vmem:[%s1759_s6 + $0xef0] sm:$0xff] %v941_v30  ;;  %1198 = vst [vmem:[%s1759_s6 + $0xef8] sm:$0xff] %v942_v31  ;;  %v946_v35 = vld [vmem:[%s1749_s29 + $0x718] sm:$0xff]  ;;  %v947_v36 = vld [vmem:[%s1749_s29 + $0x720] sm:$0xff] }
 0x144   : > { %1199 = vst [vmem:[%s1759_s6 + $0xf00] sm:$0xff] %v943_v32  ;;  %1200 = vst [vmem:[%s1759_s6 + $0xf08] sm:$0xff] %v944_v33  ;;  %v948_v37 = vld [vmem:[%s1749_s29 + $0x728] sm:$0xff]  ;;  %v949_v38 = vld [vmem:[%s1749_s29 + $0x730] sm:$0xff] }
 0x145   : > { %1201 = vst [vmem:[%s1759_s6 + $0xf10] sm:$0xff] %v945_v34  ;;  %1202 = vst [vmem:[%s1759_s6 + $0xf18] sm:$0xff] %v946_v35  ;;  %v950_v39 = vld [vmem:[%s1749_s29 + $0x738] sm:$0xff]  ;;  %v951_v40 = vld [vmem:[%s1749_s29 + $0x740] sm:$0xff] }
 0x146   : > { %1203 = vst [vmem:[%s1759_s6 + $0xf20] sm:$0xff] %v947_v36  ;;  %1204 = vst [vmem:[%s1759_s6 + $0xf28] sm:$0xff] %v948_v37  ;;  %v952_v41 = vld [vmem:[%s1749_s29 + $0x748] sm:$0xff]  ;;  %v953_v42 = vld [vmem:[%s1749_s29 + $0x750] sm:$0xff] }
 0x147   : > { %1205 = vst [vmem:[%s1759_s6 + $0xf30] sm:$0xff] %v949_v38  ;;  %1206 = vst [vmem:[%s1759_s6 + $0xf38] sm:$0xff] %v950_v39  ;;  %v954_v43 = vld [vmem:[%s1749_s29 + $0x758] sm:$0xff]  ;;  %v955_v44 = vld [vmem:[%s1749_s29 + $0x760] sm:$0xff] }
 0x148   : > { %1207 = vst [vmem:[%s1759_s6 + $0xf40] sm:$0xff] %v951_v40  ;;  %1208 = vst [vmem:[%s1759_s6 + $0xf48] sm:$0xff] %v952_v41  ;;  %v956_v45 = vld [vmem:[%s1749_s29 + $0x768] sm:$0xff]  ;;  %v957_v46 = vld [vmem:[%s1749_s29 + $0x770] sm:$0xff] }
 0x149   : > { %1209 = vst [vmem:[%s1759_s6 + $0xf50] sm:$0xff] %v953_v42  ;;  %1210 = vst [vmem:[%s1759_s6 + $0xf58] sm:$0xff] %v954_v43  ;;  %v958_v47 = vld [vmem:[%s1749_s29 + $0x778] sm:$0xff]  ;;  %v959_v48 = vld [vmem:[%s1749_s29 + $0x780] sm:$0xff] }
 0x14a   : > { %1211 = vst [vmem:[%s1759_s6 + $0xf60] sm:$0xff] %v955_v44  ;;  %1212 = vst [vmem:[%s1759_s6 + $0xf68] sm:$0xff] %v956_v45  ;;  %v960_v49 = vld [vmem:[%s1749_s29 + $0x788] sm:$0xff]  ;;  %v961_v50 = vld [vmem:[%s1749_s29 + $0x790] sm:$0xff] }
 0x14b   : > { %1213 = vst [vmem:[%s1759_s6 + $0xf70] sm:$0xff] %v957_v46  ;;  %1214 = vst [vmem:[%s1759_s6 + $0xf78] sm:$0xff] %v958_v47  ;;  %v962_v51 = vld [vmem:[%s1749_s29 + $0x798] sm:$0xff]  ;;  %v963_v52 = vld [vmem:[%s1749_s29 + $0x7a0] sm:$0xff] }
 0x14c   : > { %1215 = vst [vmem:[%s1759_s6 + $0xf80] sm:$0xff] %v959_v48  ;;  %1216 = vst [vmem:[%s1759_s6 + $0xf88] sm:$0xff] %v960_v49  ;;  %v964_v53 = vld [vmem:[%s1749_s29 + $0x7a8] sm:$0xff]  ;;  %v965_v54 = vld [vmem:[%s1749_s29 + $0x7b0] sm:$0xff] }
 0x14d   : > { %1217 = vst [vmem:[%s1759_s6 + $0xf90] sm:$0xff] %v961_v50  ;;  %1218 = vst [vmem:[%s1759_s6 + $0xf98] sm:$0xff] %v962_v51  ;;  %v966_v55 = vld [vmem:[%s1749_s29 + $0x7b8] sm:$0xff]  ;;  %v967_v56 = vld [vmem:[%s1749_s29 + $0x7c0] sm:$0xff] }
 0x14e   : > { %1219 = vst [vmem:[%s1759_s6 + $0xfa0] sm:$0xff] %v963_v52  ;;  %1220 = vst [vmem:[%s1759_s6 + $0xfa8] sm:$0xff] %v964_v53  ;;  %v968_v57 = vld [vmem:[%s1749_s29 + $0x7c8] sm:$0xff]  ;;  %v969_v58 = vld [vmem:[%s1749_s29 + $0x7d0] sm:$0xff] }
 0x14f   : > { %1221 = vst [vmem:[%s1759_s6 + $0xfb0] sm:$0xff] %v965_v54  ;;  %1222 = vst [vmem:[%s1759_s6 + $0xfb8] sm:$0xff] %v966_v55  ;;  %v970_v59 = vld [vmem:[%s1749_s29 + $0x7d8] sm:$0xff]  ;;  %v971_v60 = vld [vmem:[%s1749_s29 + $0x7e0] sm:$0xff] }
 0x150   : > { %1223 = vst [vmem:[%s1759_s6 + $0xfc0] sm:$0xff] %v967_v56  ;;  %1224 = vst [vmem:[%s1759_s6 + $0xfc8] sm:$0xff] %v968_v57  ;;  %v972_v61 = vld [vmem:[%s1749_s29 + $0x7e8] sm:$0xff]  ;;  %v973_v62 = vld [vmem:[%s1749_s29 + $0x7f0] sm:$0xff] }
 0x151   : > { %1225 = vst [vmem:[%s1759_s6 + $0xfd0] sm:$0xff] %v969_v58  ;;  %1226 = vst [vmem:[%s1759_s6 + $0xfd8] sm:$0xff] %v970_v59  ;;  %v974_v63 = vld [vmem:[%s1749_s29 + $0x7f8] sm:$0xff] }
 0x152   : > { %1227 = vst [vmem:[%s1759_s6 + $0xfe0] sm:$0xff] %v971_v60  ;;  %1228 = vst [vmem:[%s1759_s6 + $0xfe8] sm:$0xff] %v972_v61 }
 0x153   : > { %1229 = vst [vmem:[%s1759_s6 + $0xff0] sm:$0xff] %v973_v62  ;;  %1230 = vst [vmem:[%s1759_s6 + $0xff8] sm:$0xff] %v974_v63 }
 0x154   : > { %1497 = shalt.err (!%p1494_p11)
}
 0x155   : > { %s1498_s8 = scalar_lea.hbm %s2774_s28, 65536  ;;  %s1502_s19 = scalar_lea.hbm %s2835_s2, 131072 }
 0x156   : > { %p1499_p3 = scmp.ne.s32.totalorder %s2774_s28, %s1498_s8  ;;  %p1503_p2 = scmp.lt.u32.totalorder %s2774_s28, %s2835_s2 }
 0x157   : > { %p1504_p4 = scmp.lt.u32.totalorder %s1502_s19, %s1498_s8  ;;  %p1506_p13 = scmp.lt.u32.totalorder %s1498_s8, %s2774_s28 }
 0x158   : > { %p1500_p8 = pnand %p1499_p3, %p2845_p1 }
 0x159   : > { %p1505_p6 = por %p1504_p4, %p1503_p2 }
 0x15a   : > { %p1501_p0 = pneg %p1500_p8 }
 0x15b   : > { %p1507_p12 = por %p1506_p13, %p1505_p6 }
 0x15d   : > { %p1508_p10 = pnand %p1507_p12, %p1501_p0 }
 0x15f   : > { %1511 = shalt.err (!%p1508_p10)
}
 0x160   : > { %s1561_s29 = smov 16384   ;;  %s1562_s5 = smov 1024  }
 0x161   : > { %1373 = dma.vmem_to_hbm [thread:$0]  (%p2845_p1), %s2776_s14, 65536, %s2774_s28, %s1232_s24, %s1561_s29, %s1561_s29, %s1562_s5  }
 0x162 PF: > { %s1261_s6 = sand.u32 1, %s1542_s9   ;;  %p2846_p5 = scmp.ne.s32.totalorder %s2841_s22, 0 }
 0x163   : > { %p2847_p7 = scmp.ge.s32.totalorder %s1554_s12, 2  ;;  %s1262_s20 = scalar_lea.sflag [#allocation4], %s1261_s6 }
 0x165   : > { %p1383_p9 = pnand %p2847_p7, %p2846_p5 }
 0x167   : > { %1537 = dma.done.wait (!%p1383_p9), %s1262_s20, 65536  }
 0x168   : > { %1539 = vsyncadd (!%p1383_p9), %s1262_s20, 4294901760  ;;  %p18_p11 = scmp.ge.s32.totalorder %s1603_s15, 4   ;;  %s2848_s9 = smov %s1546_s10 }
 0x169   : > { %s2849_s10 = smov %s1550_s11  ;;  %s2850_s11 = smov %s1615_s18 }
 0x16a   : > { %s2851_s12 = smov %s1603_s15  ;;  %20 = sbr.rel (!%p18_p11) target bundleno = 7 (0x7), region = 86 }
 0x171   :  { %1267 = vsyncpa [#allocation3], 1 }
 0x172   :  { %1269 = vsyncpa [#allocation3 + $0x1], 1 }
 0x173   :  { %1270 = vsyncpa [#allocation6], 1 }
 0x174   :  { %1272 = vsyncpa [#allocation6 + $0x1], 1 }
 0x175   :  { %1273 = vsyncpa [#allocation4], 1 }
 0x176   :  { %1275 = vsyncpa [#allocation4 + $0x1], 1 }

</bundles_post_ra>
